<compile_context>
chip_gen: v5e
topology: v5e:2x2
jax: 0.10.0
libtpu: 0.0.40
codegen_flags: <defaults>
</compile_context>

<pallas_src>
import functools

import jax
import jax.numpy as jnp
from jax.experimental import pallas as pl
from jax.experimental.pallas import tpu as pltpu


def _round_up(a, b):
    return ((a + b - 1) // b) * b


def _choose_tm(M, tm_max=1024):
    """M-tile selection.

    Small batches -> one grid step (launch floor dominates; splitting only adds
    per-step overhead).  Large batches -> >= 4 grid steps (v7x megacore needs a
    non-trivial parallel grid), tile a multiple of 8, capped at tm_max so the
    per-step intermediates stay far below the scoped-VMEM limit.
    """
    if M <= 256:
        return M
    return min(tm_max, _round_up(pl.cdiv(M, 4), 8))


def _fused_mlp_kernel(*refs, activations, compute_dtype):
    """refs = (x_ref, w0_ref, b0_ref, w1_ref, b1_ref, ..., o_ref).

    Computes the whole MLP for one M tile; weights are VMEM-resident and all
    intermediates live in VMEM/vregs (never touch HBM).
    """
    x_ref, o_ref = refs[0], refs[-1]
    wb_refs = refs[1:-1]
    n_layers = len(wb_refs) // 2

    h = x_ref[...].astype(compute_dtype)             # (tm, in_dim)
    for i in range(n_layers):
        w = wb_refs[2 * i][...]                      # (K, N), compute_dtype
        b = wb_refs[2 * i + 1][...]                  # (1, N), f32
        # MXU matmul with f32 accumulation, fused f32 epilogue.
        y = jnp.dot(h, w, preferred_element_type=jnp.float32) + b
        act = activations[i]
        if act == "relu":
            y = jnp.maximum(y, 0.0)
        elif act == "sigmoid":
            y = jax.nn.sigmoid(y)
        if i != n_layers - 1:
            h = y.astype(compute_dtype)              # fused downcast, one copy
        else:
            h = y
    o_ref[...] = h.astype(o_ref.dtype)


def mlp_forward(x, params, *, activations, compute_dtype=jnp.bfloat16,
                tm_max=1024):
    """Fused MLP forward.  x: (M, in_dim); params: [(w_t (K,N), b (1,N)), ...].

    Returns (M, N_last) where N_last may be lane-padded; caller slices.
    """
    M, in_dim = x.shape
    out_dim_p = params[-1][0].shape[1]

    tm = _choose_tm(M, tm_max)
    grid = (pl.cdiv(M, tm),)

    in_specs = [pl.BlockSpec((tm, in_dim), lambda i: (i, 0))]
    flat_args = [x]
    for (w_t, b) in params:
        # Resident across the grid (constant block index) -> single-buffer.
        in_specs.append(pl.BlockSpec(w_t.shape, lambda i: (0, 0),
                                     pipeline_mode=pl.Buffered(1)))
        in_specs.append(pl.BlockSpec(b.shape, lambda i: (0, 0),
                                     pipeline_mode=pl.Buffered(1)))
        flat_args.extend([w_t, b])

    kernel = functools.partial(_fused_mlp_kernel,
                               activations=tuple(activations),
                               compute_dtype=compute_dtype)
    return pl.pallas_call(
        kernel,
        out_shape=jax.ShapeDtypeStruct((M, out_dim_p), x.dtype),
        grid_spec=pltpu.PrefetchScalarGridSpec(
            num_scalar_prefetch=0,
            grid=grid,
            in_specs=in_specs,
            out_specs=pl.BlockSpec((tm, out_dim_p), lambda i: (i, 0)),
        ),
        compiler_params=pltpu.CompilerParams(
            dimension_semantics=("parallel",),
            # Large tm headroom on v5e (16 MiB default scoped VMEM); still well
            # under v7x's 64 MiB physical VMEM.
            vmem_limit_bytes=32 * 1024 * 1024,
        ),
    )(*flat_args)


class PallasMLP:
    """Mirrors the PyTorch MLP forward: Linear -> act -> ... -> Linear [-> sigmoid]."""

    def __init__(self, input_dim, output_dim, hidden_size=(1024, 512),
                 activation="relu", discrim=False, dropout=-1, *,
                 key, compute_dtype=jnp.bfloat16, tm_max=1024):
        if dropout != -1:
            # TODO(synk): training-mode nn.Dropout is not implemented in the
            # fused kernel; raise rather than silently diverge.
            raise NotImplementedError("dropout != -1 is not supported")

        dims = [input_dim, *hidden_size, output_dim]
        n = len(dims) - 1
        self.compute_dtype = compute_dtype
        self.output_dim = output_dim

        self.params = []
        acts = []
        for i in range(n):
            key, wk, bk = jax.random.split(key, 3)
            fan_in = dims[i]
            bound = 1.0 / float(fan_in) ** 0.5
            # Deterministic init mimicking nn.Linear's uniform(-1/sqrt(fan_in), ...).
            w = jax.random.uniform(wk, (dims[i + 1], dims[i]),
                                   minval=-bound, maxval=bound,
                                   dtype=jnp.float32)
            b = jax.random.uniform(bk, (dims[i + 1],),
                                   minval=-bound, maxval=bound,
                                   dtype=jnp.float32)
            w_t = w.T                                  # (in, out)
            b2 = b.reshape(1, -1)
            if i == n - 1 and dims[i + 1] % 128 != 0:
                # Lane-pad the final layer so the last matmul is full MXU width
                # and the output store is lane-dense/unmasked.
                pad_to = _round_up(dims[i + 1], 128)
                w_t = jnp.pad(w_t, ((0, 0), (0, pad_to - dims[i + 1])))
                b2 = jnp.pad(b2, ((0, 0), (0, pad_to - dims[i + 1])))
            # Weights stored in the matmul compute dtype (bf16 halves weight
            # DMA bytes); bias kept f32 for the f32 epilogue.
            self.params.append((w_t.astype(compute_dtype),
                                b2.astype(jnp.float32)))
            if i != n - 1:
                acts.append(activation)                # act between hidden layers
            else:
                acts.append("sigmoid" if discrim else None)
        self.activations = tuple(acts)

        out_dim = output_dim

        def _fwd(x, params):
            y = mlp_forward(x, params, activations=self.activations,
                            compute_dtype=compute_dtype, tm_max=tm_max)
            return y[:, :out_dim]

        # jit once: removes per-call Python/XLA dispatch overhead.
        self._forward = jax.jit(_fwd)

    def __call__(self, x):
        return self._forward(x, self.params)


def _reference(x, params, activations, out_dim, matmul_dtype):
    """Pure-JAX reference with the same matmul dtype as the kernel."""
    h = x
    for i, (w_t, b) in enumerate(params):
        h = jnp.dot(h.astype(matmul_dtype), w_t,
                    preferred_element_type=jnp.float32) + b
        if activations[i] == "relu":
            h = jnp.maximum(h, 0.0)
        elif activations[i] == "sigmoid":
            h = jax.nn.sigmoid(h)
    return h[:, :out_dim]


if __name__ == "__main__":
    key = jax.random.PRNGKey(0)
    key, xkey, x2key, mkey, m32key = jax.random.split(key, 5)

    batch, input_dim, output_dim = 16, 32, 8
    hidden_size = (1024, 512)

    # --- bf16-compute model, small batch (single grid step) -----------------
    mlp = PallasMLP(input_dim, output_dim, hidden_size=hidden_size,
                    activation="relu", discrim=False, dropout=-1, key=mkey)

    x = jax.random.normal(xkey, (batch, input_dim), dtype=jnp.float32)
    out = mlp(x)
    jax.block_until_ready(out)
    assert out.shape == (batch, output_dim)

    # Reference 1: same bf16-input / f32-accumulate matmuls as the kernel.
    ref = _reference(x, mlp.params, mlp.activations, output_dim,
                     mlp.compute_dtype)
    assert jnp.allclose(out, ref, atol=2e-3, rtol=2e-3), \
        float(jnp.max(jnp.abs(out - ref)))

    # Reference 2: pure-f32 math (PyTorch Linear semantics); bf16 matmul
    # inputs only introduce sub-percent error at these layer widths.
    ref32 = _reference(x, [(w.astype(jnp.float32), b) for w, b in mlp.params],
                       mlp.activations, output_dim, jnp.float32)
    assert jnp.allclose(out, ref32, atol=5e-2, rtol=5e-2), \
        float(jnp.max(jnp.abs(out - ref32)))

    # --- bf16-compute model, larger batch (multi-step grid + ragged tail) ---
    x_big = jax.random.normal(x2key, (600, input_dim), dtype=jnp.float32)
    out_big = mlp(x_big)
    jax.block_until_ready(out_big)
    assert out_big.shape == (600, output_dim)
    ref_big = _reference(x_big, mlp.params, mlp.activations, output_dim,
                         mlp.compute_dtype)
    assert jnp.allclose(out_big, ref_big, atol=2e-3, rtol=2e-3), \
        float(jnp.max(jnp.abs(out_big - ref_big)))

    # --- f32-compute escape hatch, discriminator head (final sigmoid) -------
    mlp32 = PallasMLP(input_dim, output_dim, hidden_size=hidden_size,
                      activation="relu", discrim=True, dropout=-1,
                      key=m32key, compute_dtype=jnp.float32)
    out32 = mlp32(x)
    jax.block_until_ready(out32)
    assert out32.shape == (batch, output_dim)
    ref32d = _reference(x, mlp32.params, mlp32.activations, output_dim,
                        jnp.float32)
    assert jnp.allclose(out32, ref32d, atol=1e-5, rtol=1e-5), \
        float(jnp.max(jnp.abs(out32 - ref32d)))

    print("KERNEL_OK")
</pallas_src>

<mosaic_0001>
module attributes {stable_mosaic.version = 11 : i64} {
  func.func @_fused_mlp_kernel(%arg0: i32, %arg1: memref<16x32xf32, #tpu.memory_space<vmem>>, %arg2: memref<32x1024xbf16, #tpu.memory_space<vmem>>, %arg3: memref<1x1024xf32, #tpu.memory_space<vmem>>, %arg4: memref<1024x512xbf16, #tpu.memory_space<vmem>>, %arg5: memref<1x512xf32, #tpu.memory_space<vmem>>, %arg6: memref<512x128xbf16, #tpu.memory_space<vmem>>, %arg7: memref<1x128xf32, #tpu.memory_space<vmem>>, %arg8: memref<16x128xf32, #tpu.memory_space<vmem>>) attributes {dimension_semantics = [#tpu.dimension_semantics<parallel>], iteration_bounds = array<i64: 1>, scalar_prefetch = 0 : i64, scratch_operands = 0 : i64, tpu.core_type = #tpu.core_type<tc>, window_params = [{transform_indices = @transform_0, window_bounds = array<i64: 16, 32>}, {pipeline_mode = #tpu.pipeline_mode<synchronous>, transform_indices = @transform_1, window_bounds = array<i64: 32, 1024>}, {pipeline_mode = #tpu.pipeline_mode<synchronous>, transform_indices = @transform_2, window_bounds = array<i64: 1, 1024>}, {pipeline_mode = #tpu.pipeline_mode<synchronous>, transform_indices = @transform_3, window_bounds = array<i64: 1024, 512>}, {pipeline_mode = #tpu.pipeline_mode<synchronous>, transform_indices = @transform_4, window_bounds = array<i64: 1, 512>}, {pipeline_mode = #tpu.pipeline_mode<synchronous>, transform_indices = @transform_5, window_bounds = array<i64: 512, 128>}, {pipeline_mode = #tpu.pipeline_mode<synchronous>, transform_indices = @transform_6, window_bounds = array<i64: 1, 128>}, {transform_indices = @transform_7, window_bounds = array<i64: 16, 128>}]} {
    %c0 = arith.constant 0 : index
    %c0_0 = arith.constant 0 : index
    %0 = vector.load %arg1[%c0, %c0_0] : memref<16x32xf32, #tpu.memory_space<vmem>>, vector<16x32xf32>
    %1 = arith.truncf %0 : vector<16x32xf32> to vector<16x32xbf16>
    %c0_1 = arith.constant 0 : index
    %c0_2 = arith.constant 0 : index
    %2 = vector.load %arg2[%c0_1, %c0_2] : memref<32x1024xbf16, #tpu.memory_space<vmem>>, vector<32x1024xbf16>
    %c0_3 = arith.constant 0 : index
    %c0_4 = arith.constant 0 : index
    %3 = vector.load %arg3[%c0_3, %c0_4] : memref<1x1024xf32, #tpu.memory_space<vmem>>, vector<1x1024xf32>
    %cst = arith.constant dense<0.000000e+00> : vector<16x1024xf32>
    %4 = tpu.matmul %1, %2, %cst {dimension_numbers = #tpu.dot_dimension_numbers<[1], [0], [0], [1], [0, 0, 1, 1], [], []>} : vector<16x32xbf16>, vector<32x1024xbf16>, vector<16x1024xf32> -> vector<16x1024xf32>
    %5 = vector.broadcast %3 : vector<1x1024xf32> to vector<16x1024xf32>
    %6 = arith.addf %4, %5 : vector<16x1024xf32>
    %cst_5 = arith.constant 0.000000e+00 : f32
    %7 = vector.broadcast %cst_5 : f32 to vector<16x1024xf32>
    %8 = arith.maximumf %6, %7 : vector<16x1024xf32>
    %9 = arith.truncf %8 : vector<16x1024xf32> to vector<16x1024xbf16>
    %c0_6 = arith.constant 0 : index
    %c0_7 = arith.constant 0 : index
    %10 = vector.load %arg4[%c0_6, %c0_7] : memref<1024x512xbf16, #tpu.memory_space<vmem>>, vector<1024x512xbf16>
    %c0_8 = arith.constant 0 : index
    %c0_9 = arith.constant 0 : index
    %11 = vector.load %arg5[%c0_8, %c0_9] : memref<1x512xf32, #tpu.memory_space<vmem>>, vector<1x512xf32>
    %cst_10 = arith.constant dense<0.000000e+00> : vector<16x512xf32>
    %12 = tpu.matmul %9, %10, %cst_10 {dimension_numbers = #tpu.dot_dimension_numbers<[1], [0], [0], [1], [0, 0, 1, 1], [], []>} : vector<16x1024xbf16>, vector<1024x512xbf16>, vector<16x512xf32> -> vector<16x512xf32>
    %13 = vector.broadcast %11 : vector<1x512xf32> to vector<16x512xf32>
    %14 = arith.addf %12, %13 : vector<16x512xf32>
    %cst_11 = arith.constant 0.000000e+00 : f32
    %15 = vector.broadcast %cst_11 : f32 to vector<16x512xf32>
    %16 = arith.maximumf %14, %15 : vector<16x512xf32>
    %17 = arith.truncf %16 : vector<16x512xf32> to vector<16x512xbf16>
    %c0_12 = arith.constant 0 : index
    %c0_13 = arith.constant 0 : index
    %18 = vector.load %arg6[%c0_12, %c0_13] : memref<512x128xbf16, #tpu.memory_space<vmem>>, vector<512x128xbf16>
    %c0_14 = arith.constant 0 : index
    %c0_15 = arith.constant 0 : index
    %19 = vector.load %arg7[%c0_14, %c0_15] : memref<1x128xf32, #tpu.memory_space<vmem>>, vector<1x128xf32>
    %cst_16 = arith.constant dense<0.000000e+00> : vector<16x128xf32>
    %20 = tpu.matmul %17, %18, %cst_16 {dimension_numbers = #tpu.dot_dimension_numbers<[1], [0], [0], [1], [0, 0, 1, 1], [], []>} : vector<16x512xbf16>, vector<512x128xbf16>, vector<16x128xf32> -> vector<16x128xf32>
    %21 = vector.broadcast %19 : vector<1x128xf32> to vector<16x128xf32>
    %22 = arith.addf %20, %21 : vector<16x128xf32>
    %c0_17 = arith.constant 0 : index
    %c0_18 = arith.constant 0 : index
    %23 = vector.load %arg8[%c0_17, %c0_18] : memref<16x128xf32, #tpu.memory_space<vmem>>, vector<16x128xf32>
    tpu.vector_store %arg8[%c0_17, %c0_18], %22 {strides = array<i32>} : memref<16x128xf32, #tpu.memory_space<vmem>>, vector<16x128xf32>,
    return
  }
  func.func @transform_0(%arg0: i32) -> (i32, i32) {
    %c0_i32 = arith.constant 0 : i32
    %c0_i32_0 = arith.constant 0 : i32
    return %arg0, %c0_i32 : i32, i32
  }
  func.func @transform_1(%arg0: i32) -> (i32, i32) {
    %c0_i32 = arith.constant 0 : i32
    %c0_i32_0 = arith.constant 0 : i32
    %c0_i32_1 = arith.constant 0 : i32
    return %c0_i32, %c0_i32_0 : i32, i32
  }
  func.func @transform_2(%arg0: i32) -> (i32, i32) {
    %c0_i32 = arith.constant 0 : i32
    %c0_i32_0 = arith.constant 0 : i32
    %c0_i32_1 = arith.constant 0 : i32
    return %c0_i32, %c0_i32_0 : i32, i32
  }
  func.func @transform_3(%arg0: i32) -> (i32, i32) {
    %c0_i32 = arith.constant 0 : i32
    %c0_i32_0 = arith.constant 0 : i32
    %c0_i32_1 = arith.constant 0 : i32
    return %c0_i32, %c0_i32_0 : i32, i32
  }
  func.func @transform_4(%arg0: i32) -> (i32, i32) {
    %c0_i32 = arith.constant 0 : i32
    %c0_i32_0 = arith.constant 0 : i32
    %c0_i32_1 = arith.constant 0 : i32
    return %c0_i32, %c0_i32_0 : i32, i32
  }
  func.func @transform_5(%arg0: i32) -> (i32, i32) {
    %c0_i32 = arith.constant 0 : i32
    %c0_i32_0 = arith.constant 0 : i32
    %c0_i32_1 = arith.constant 0 : i32
    return %c0_i32, %c0_i32_0 : i32, i32
  }
  func.func @transform_6(%arg0: i32) -> (i32, i32) {
    %c0_i32 = arith.constant 0 : i32
    %c0_i32_0 = arith.constant 0 : i32
    %c0_i32_1 = arith.constant 0 : i32
    return %c0_i32, %c0_i32_0 : i32, i32
  }
  func.func @transform_7(%arg0: i32) -> (i32, i32) {
    %c0_i32 = arith.constant 0 : i32
    %c0_i32_0 = arith.constant 0 : i32
    return %arg0, %c0_i32 : i32, i32
  }
}

</mosaic_0001>

<bundles_post_ra>
// kernel: _fwd.1
= control target key start
LH: loop header
LB: loop body
LE: loop exit
PB: predicated region body
PF: predicated region fallthrough
CT: control target
= control target key end

     0   :  { %12 = vsyncpa [#allocation3], 0  ;;  %s4612_s0 = inlined_call_operand.hbm [shape: f32[16,32], index: 0, kind: input, shape index: {}]   ;;  %s4613_s1 = inlined_call_operand.hbm [shape: bf16[32,1024], index: 1, kind: input, shape index: {}]   ;;  %s4614_s2 = inlined_call_operand.hbm [shape: f32[1,1024], index: 2, kind: input, shape index: {}]   ;;  %s4615_s3 = inlined_call_operand.hbm [shape: bf16[1024,512], index: 3, kind: input, shape index: {}]   ;;  %s4616_s4 = inlined_call_operand.hbm [shape: f32[1,512], index: 4, kind: input, shape index: {}]   ;;  %s4617_s5 = inlined_call_operand.hbm [shape: bf16[512,128], index: 5, kind: input, shape index: {}]   ;;  %s4618_s6 = inlined_call_operand.vmem [shape: f32[1,128], index: 6, kind: input, shape index: {}]   ;;  %s4619_s7 = inlined_call_operand.vmem [shape: f32[16,128], index: 7, kind: output, shape index: {}]  }
   0x1   :  { %13 = vsyncpa [#allocation5], 0 }
   0x2   :  { %14 = vsyncpa [#allocation8], 0  ;;  %s33_s26 = sshll.u32 %s4613_s1, 4  ;;  %s34_s26 = int_to_ptr.hbm [resolvable:$true] %s33_s26 }
   0x3   :  { %15 = vsyncpa [#allocation11], 0  ;;  %s4401_s27 = smov [#allocation4]   ;;  %s57_s8 = sshll.u32 %s4615_s3, 4  ;;  %s58_s8 = int_to_ptr.hbm [resolvable:$true] %s57_s8 }
   0x4   :  { %s35_s28 = sshll.u32 %s4401_s27, 4  ;;  %s4402_s9 = smov 512   ;;  %s36_s28 = int_to_ptr.vmem [resolvable:$true] %s35_s28 }
   0x5   :  { %s4403_s10 = smov 32   ;;  %s4404_s11 = smov [#allocation7]  }
   0x6   :  { %41 = dma.hbm_to_vmem [thread:$0]  %s34_s26, 2048, %s36_s28, [#allocation5], %s4402_s9, %s4402_s9, %s4403_s10  }
   0x7   :  { %s59_s12 = sshll.u32 %s4404_s11, 4  ;;  %s4405_s13 = smov 256   ;;  %s60_s12 = int_to_ptr.vmem [resolvable:$true] %s59_s12 }
   0x8   :  { %s4406_s14 = smov 16   ;;  %s20_s16 = sshll.u32 %s4612_s0, 4  ;;  %s21_s16 = int_to_ptr.hbm [resolvable:$true] %s20_s16 }
   0x9   :  { %65 = dma.hbm_to_vmem [thread:$0]  %s58_s8, 32768, %s60_s12, [#allocation8], %s4405_s13, %s4405_s13, %s4406_s14  }
   0xa   :  { %s4407_s17 = smov [#allocation2]   ;;  %s47_s20 = sshll.u32 %s4614_s2, 4  ;;  %s48_s20 = int_to_ptr.hbm [resolvable:$true] %s47_s20 }
   0xb   :  { %s22_s18 = sshll.u32 %s4407_s17, 4  ;;  %s4408_s21 = smov 128   ;;  %s23_s18 = int_to_ptr.vmem [resolvable:$true] %s22_s18 }
   0xc   :  { %s4409_s22 = smov 8   ;;  %s4410_s23 = smov [#allocation6]  }
   0xd   :  { %28 = dma.hbm_to_vmem [thread:$0]  %s21_s16, 256, %s23_s18, [#allocation3], %s4408_s21, %s4408_s21, %s4409_s22  }
   0xe   :  { %s49_s24 = sshll.u32 %s4410_s23, 4  ;;  %s71_s27 = sshll.u32 %s4616_s4, 4  ;;  %s50_s24 = int_to_ptr.vmem [resolvable:$true] %s49_s24  ;;  %s72_s27 = int_to_ptr.hbm [resolvable:$true] %s71_s27 }
   0xf   :  { %52 = dma.hbm_to_vmem [thread:$0]  %s48_s20, 128, %s50_s24, [#allocation5]  }
  0x10   :  { %s81_s29 = sshll.u32 %s4617_s5, 4  ;;  %s4411_s30 = smov [#allocation9]   ;;  %s82_s29 = int_to_ptr.hbm [resolvable:$true] %s81_s29 }
  0x11   :  { %s73_s8 = sshll.u32 %s4411_s30, 4  ;;  %s4412_s2 = smov [#allocation10]   ;;  %s74_s8 = int_to_ptr.vmem [resolvable:$true] %s73_s8 }
  0x12   :  { %76 = dma.hbm_to_vmem [thread:$0]  %s72_s27, 64, %s74_s8, [#allocation8]  }
  0x13   :  { %s83_s9 = sshll.u32 %s4412_s2, 4  ;;  %s4413_s10 = smov 64   ;;  %s84_s9 = int_to_ptr.vmem [resolvable:$true] %s83_s9 }
  0x14   :  { %s4414_s11 = smov 4  }
  0x15   :  { %89 = dma.hbm_to_vmem [thread:$0]  %s82_s29, 4096, %s84_s9, [#allocation11], %s4413_s10, %s4413_s10, %s4414_s11  }
  0x16   :  { %4393 = dma.done.wait [#allocation3], 256  }
  0x17   :  { %4394 = vsyncadd [#allocation3], 4294967040 }
  0x18   :  { %4395 = dma.done.wait [#allocation5], 2176  }
  0x19   :  { %4396 = vsyncadd [#allocation5], 4294965120 }
  0x1a   :  { %4397 = dma.done.wait [#allocation8], 32832  }
  0x1b   :  { %4398 = vsyncadd [#allocation8], 4294934464 }
  0x1c   :  { %4399 = dma.done.wait [#allocation11], 4096  }
  0x1d   :  { %4400 = vsyncadd [#allocation11], 4294963200  ;;  %v2740_v0 = vld [vmem:[#allocation4 + $0x40] sm:$0xf]  ;;  %v3938_v2 = vld [vmem:[#allocation4 + $0x44] sm:$0xf] }
  0x1e   :  { %v3942_v1 = vld [vmem:[#allocation4 + $0x5c] sm:$0xf0]  ;;  %v2742_v4 = vld [vmem:[#allocation4 + $0x60] sm:$0xf0]  ;;  %v2748_v5 = vld [vmem:[#allocation4 + $0x48] sm:$0xf] }
  0x1f   :  { %v2741_v3 = vor.u32 %v3942_v1, %v2740_v0  ;;  %v3943_v6 = vld [vmem:[#allocation4 + $0x64] sm:$0xf0]  ;;  %v2745_v7 = vor.u32 %v3938_v2, %v2742_v4  ;;  %v3939_v9 = vld [vmem:[#allocation4 + $0x4c] sm:$0xf]  ;;  %v2708_v11 = vld [vmem:[#allocation4] sm:$0xf] }
  0x20   :  { %v2749_v8 = vor.u32 %v3943_v6, %v2748_v5  ;;  %v2750_v10 = vld [vmem:[#allocation4 + $0x68] sm:$0xf0]  ;;  %v3934_v13 = vld [vmem:[#allocation4 + $0x1c] sm:$0xf0]  ;;  %v3930_v14 = vld [vmem:[#allocation4 + $0x4] sm:$0xf] }
  0x21   :  { %244 = vmatpush.bf16.msra.mxu0 %v2741_v3  ;;  %v2753_v12 = vor.u32 %v3939_v9, %v2750_v10  ;;  %v2710_v15 = vld [vmem:[#allocation4 + $0x20] sm:$0xf0]  ;;  %258 = vmatpush.bf16.msra.mxu1 %v2745_v7  ;;  %v2709_v16 = vor.u32 %v3934_v13, %v2708_v11  ;;  %v2716_v18 = vld [vmem:[#allocation4 + $0x8] sm:$0xf]  ;;  %v3931_v20 = vld [vmem:[#allocation4 + $0xc] sm:$0xf] }
  0x22   :  { %272 = vmatpush.bf16.msra.mxu2 %v2749_v8  ;;  %v2713_v17 = vor.u32 %v3930_v14, %v2710_v15  ;;  %v3935_v19 = vld [vmem:[#allocation4 + $0x24] sm:$0xf0]  ;;  %v2718_v22 = vld [vmem:[#allocation4 + $0x28] sm:$0xf0]  ;;  %v117_v23 = vld [vmem:[#allocation2] sm:$0xff]  ;;  %vm234_vm0 = vcmask 261120  }
  0x23   :  { %286 = vmatpush.bf16.msra.mxu3 %v2753_v12  ;;  %v2717_v21 = vor.u32 %v3935_v19, %v2716_v18  ;;  %v118_v24 = vld [vmem:[#allocation2 + $0x8] sm:$0xff]  ;;  %v2721_v25 = vor.u32 %v3931_v20, %v2718_v22  ;;  %v2756_v27 = vld [vmem:[#allocation4 + $0x50] sm:$0xf]  ;;  %v3940_v29 = vld [vmem:[#allocation4 + $0x54] sm:$0xf] }
  0x24   :  { %v4473_v26 = vpack.c.bf16 %v118_v24, %v117_v23  ;;  %v3944_v28 = vld [vmem:[#allocation4 + $0x6c] sm:$0xf0]  ;;  %v2758_v31 = vld [vmem:[#allocation4 + $0x70] sm:$0xf0]  ;;  %v2764_v32 = vld [vmem:[#allocation4 + $0x58] sm:$0xf] }
  0x25   :  { %245 = vmatpush.bf16.msra.mxu0 %v2709_v16  ;;  %v2757_v30 = vor.u32 %v3944_v28, %v2756_v27  ;;  %v3945_v33 = vld [vmem:[#allocation4 + $0x74] sm:$0xf0]  ;;  %259 = vmatpush.bf16.msra.mxu1 %v2713_v17  ;;  %v2761_v34 = vor.u32 %v3940_v29, %v2758_v31  ;;  %v3941_v36 = vld [vmem:[#allocation4 + $0x5c] sm:$0xf]  ;;  %v2724_v38 = vld [vmem:[#allocation4 + $0x10] sm:$0xf] }
  0x26   :  { %273 = vmatpush.bf16.msra.mxu2 %v2717_v21  ;;  %v2765_v35 = vor.u32 %v3945_v33, %v2764_v32  ;;  %v2766_v37 = vld [vmem:[#allocation4 + $0x78] sm:$0xf0]  ;;  %v3936_v40 = vld [vmem:[#allocation4 + $0x2c] sm:$0xf0]  ;;  %v3932_v41 = vld [vmem:[#allocation4 + $0x14] sm:$0xf] }
  0x27   :  { %287 = vmatpush.bf16.msra.mxu3 %v2721_v25  ;;  %v2769_v39 = vor.u32 %v3941_v36, %v2766_v37  ;;  %v2726_v42 = vld [vmem:[#allocation4 + $0x30] sm:$0xf0]  ;;  %v2725_v43 = vor.u32 %v3936_v40, %v2724_v38  ;;  %v2732_v45 = vld [vmem:[#allocation4 + $0x18] sm:$0xf]  ;;  %v3933_v47 = vld [vmem:[#allocation4 + $0x1c] sm:$0xf] }
  0x28   :  { %2770 = vmatmul.msk.bf16.vlgmr.msra.gmra.mxu0 %vm234_vm0, %v4473_v26  ;;  %v2729_v44 = vor.u32 %v3932_v41, %v2726_v42  ;;  %v3937_v46 = vld [vmem:[#allocation4 + $0x34] sm:$0xf0]  ;;  %2771 = vmatmul.msk.bf16.vlgmr.msra.gmra.mxu1 %vm234_vm0, %v4473_v26  ;;  %v2734_v48 = vld [vmem:[#allocation4 + $0x38] sm:$0xf0]  ;;  %v2892_v49 = vld [vmem:[#allocation7 + $0xe0] sm:$0xf] }
  0x29   :  { %300 = vmatpush.bf16.msrb.mxu0 %v2757_v30  ;;  %314 = vmatpush.bf16.msrb.mxu1 %v2761_v34  ;;  %v3976_v50 = vld [vmem:[#allocation7 + $0xec] sm:$0xf0]  ;;  %v2733_v51 = vor.u32 %v3937_v46, %v2732_v45  ;;  %v3020_v53 = vld [vmem:[#allocation7 + $0x1e0] sm:$0xf]  ;;  %v2737_v56 = vor.u32 %v3933_v47, %v2734_v48 }
  0x2a   :  { %2772 = vmatmul.msk.bf16.vlgmr.msra.gmra.mxu2 %vm234_vm0, %v4473_v26  ;;  %2773 = vmatmul.msk.bf16.vlgmr.msra.gmra.mxu3 %vm234_vm0, %v4473_v26  ;;  %v2893_v52 = vor.u32 %v3976_v50, %v2892_v49  ;;  %v4008_v54 = vld [vmem:[#allocation7 + $0x1ec] sm:$0xf0]  ;;  %v2876_v55 = vld [vmem:[#allocation7 + $0xc0] sm:$0xf] }
  0x2b   :  { %328 = vmatpush.bf16.msrb.mxu2 %v2765_v35  ;;  %342 = vmatpush.bf16.msrb.mxu3 %v2769_v39  ;;  %v3021_v57 = vor.u32 %v4008_v54, %v3020_v53  ;;  %v3972_v58 = vld [vmem:[#allocation7 + $0xcc] sm:$0xf0]  ;;  %v3004_v59 = vld [vmem:[#allocation7 + $0x1c0] sm:$0xf] }
  0x2c   :  { %v4004_v60 = vld [vmem:[#allocation7 + $0x1cc] sm:$0xf0]  ;;  %v2877_v61 = vor.u32 %v3972_v58, %v2876_v55  ;;  %v3148_v62 = vld [vmem:[#allocation7 + $0x2e0] sm:$0xf] }
  0x2d   :  { %301 = vmatpush.bf16.msrb.mxu0 %v2725_v43  ;;  %315 = vmatpush.bf16.msrb.mxu1 %v2729_v44  ;;  %v4040_v63 = vld [vmem:[#allocation7 + $0x2ec] sm:$0xf0]  ;;  %v3276_v0 = vld [vmem:[#allocation7 + $0x3e0] sm:$0xf]  ;;  %v3005_v1 = vor.u32 %v4004_v60, %v3004_v59 }
  0x2e   :  { %v3149_v2 = vor.u32 %v4040_v63, %v3148_v62  ;;  %v4072_v3 = vld [vmem:[#allocation7 + $0x3ec] sm:$0xf0]  ;;  %v2860_v4 = vld [vmem:[#allocation7 + $0xa0] sm:$0xf] }
  0x2f   :  { %v3968_v5 = vld [vmem:[#allocation7 + $0xac] sm:$0xf0]  ;;  %329 = vmatpush.bf16.msrb.mxu2 %v2733_v51  ;;  %v3277_v6 = vor.u32 %v4072_v3, %v3276_v0  ;;  %v2988_v7 = vld [vmem:[#allocation7 + $0x1a0] sm:$0xf]  ;;  %343 = vmatpush.bf16.msrb.mxu3 %v2737_v56 }
  0x30   :  { %v4000_v8 = vld [vmem:[#allocation7 + $0x1ac] sm:$0xf0]  ;;  %v3132_v9 = vld [vmem:[#allocation7 + $0x2c0] sm:$0xf]  ;;  %v2861_v13 = vor.u32 %v3968_v5, %v2860_v4 }
  0x31   :  { %1920 = vmatpush.bf16.msra.mxu0 %v2893_v52  ;;  %1934 = vmatpush.bf16.msra.mxu1 %v3021_v57  ;;  %v4036_v10 = vld [vmem:[#allocation7 + $0x2cc] sm:$0xf0]  ;;  %v3260_v11 = vld [vmem:[#allocation7 + $0x3c0] sm:$0xf]  ;;  %v2989_v16 = vor.u32 %v4000_v8, %v2988_v7 }
  0x32   :  { %v4068_v12 = vld [vmem:[#allocation7 + $0x3cc] sm:$0xf0]  ;;  %v3133_v14 = vor.u32 %v4036_v10, %v3132_v9  ;;  %v3116_v17 = vld [vmem:[#allocation7 + $0x2a0] sm:$0xf] }
  0x33   :  { %1948 = vmatpush.bf16.msra.mxu2 %v3149_v2  ;;  %1962 = vmatpush.bf16.msra.mxu3 %v3277_v6  ;;  %v3261_v15 = vor.u32 %v4068_v12, %v3260_v11  ;;  %v4032_v18 = vld [vmem:[#allocation7 + $0x2ac] sm:$0xf0]  ;;  %v3244_v19 = vld [vmem:[#allocation7 + $0x3a0] sm:$0xf] }
  0x34   :  { %v4064_v20 = vld [vmem:[#allocation7 + $0x3ac] sm:$0xf0]  ;;  %v2844_v21 = vld [vmem:[#allocation7 + $0x80] sm:$0xf]  ;;  %v3117_v24 = vor.u32 %v4032_v18, %v3116_v17 }
  0x35   :  { %1921 = vmatpush.bf16.msra.mxu0 %v2877_v61  ;;  %1935 = vmatpush.bf16.msra.mxu1 %v3005_v1  ;;  %v3964_v22 = vld [vmem:[#allocation7 + $0x8c] sm:$0xf0]  ;;  %v2972_v23 = vld [vmem:[#allocation7 + $0x180] sm:$0xf]  ;;  %v3245_v27 = vor.u32 %v4064_v20, %v3244_v19 }
  0x36   :  { %v3996_v25 = vld [vmem:[#allocation7 + $0x18c] sm:$0xf0]  ;;  %v3100_v28 = vld [vmem:[#allocation7 + $0x280] sm:$0xf]  ;;  %v2845_v32 = vor.u32 %v3964_v22, %v2844_v21 }
  0x37   :  { %1949 = vmatpush.bf16.msra.mxu2 %v3133_v14  ;;  %1963 = vmatpush.bf16.msra.mxu3 %v3261_v15  ;;  %v4028_v29 = vld [vmem:[#allocation7 + $0x28c] sm:$0xf0]  ;;  %v3228_v30 = vld [vmem:[#allocation7 + $0x380] sm:$0xf]  ;;  %v2973_v33 = vor.u32 %v3996_v25, %v2972_v23 }
  0x38   :  { %v4060_v31 = vld [vmem:[#allocation7 + $0x38c] sm:$0xf0]  ;;  %v2828_v34 = vld [vmem:[#allocation7 + $0x60] sm:$0xf]  ;;  %v3101_v37 = vor.u32 %v4028_v29, %v3100_v28  ;;  %2774 = vmatmul.msk.bf16.vlgmr.msrb.gmra.mxu0 %vm234_vm0, %v4473_v26  ;;  %2775 = vmatmul.msk.bf16.vlgmr.msrb.gmra.mxu1 %vm234_vm0, %v4473_v26 }
  0x39   :  { %1922 = vmatpush.bf16.msra.mxu0 %v2861_v13  ;;  %1936 = vmatpush.bf16.msra.mxu1 %v2989_v16  ;;  %v3960_v35 = vld [vmem:[#allocation7 + $0x6c] sm:$0xf0]  ;;  %v2956_v36 = vld [vmem:[#allocation7 + $0x160] sm:$0xf]  ;;  %v3229_v39 = vor.u32 %v4060_v31, %v3228_v30 }
  0x3a   :  { %v3992_v38 = vld [vmem:[#allocation7 + $0x16c] sm:$0xf0]  ;;  %v3084_v40 = vld [vmem:[#allocation7 + $0x260] sm:$0xf]  ;;  %2776 = vmatmul.msk.bf16.vlgmr.msrb.gmra.mxu2 %vm234_vm0, %v4473_v26  ;;  %2777 = vmatmul.msk.bf16.vlgmr.msrb.gmra.mxu3 %vm234_vm0, %v4473_v26  ;;  %v2829_v44 = vor.u32 %v3960_v35, %v2828_v34 }
  0x3b   :  { %1950 = vmatpush.bf16.msra.mxu2 %v3117_v24  ;;  %1964 = vmatpush.bf16.msra.mxu3 %v3245_v27  ;;  %v4024_v41 = vld [vmem:[#allocation7 + $0x26c] sm:$0xf0]  ;;  %v3212_v42 = vld [vmem:[#allocation7 + $0x360] sm:$0xf]  ;;  %v2957_v45 = vor.u32 %v3992_v38, %v2956_v36 }
  0x3c   :  { %v4056_v43 = vld [vmem:[#allocation7 + $0x36c] sm:$0xf0]  ;;  %v2812_v46 = vld [vmem:[#allocation7 + $0x40] sm:$0xf]  ;;  %v3085_v49 = vor.u32 %v4024_v41, %v3084_v40 }
  0x3d   :  { %1923 = vmatpush.bf16.msra.mxu0 %v2845_v32  ;;  %1937 = vmatpush.bf16.msra.mxu1 %v2973_v33  ;;  %v3956_v47 = vld [vmem:[#allocation7 + $0x4c] sm:$0xf0]  ;;  %v2940_v48 = vld [vmem:[#allocation7 + $0x140] sm:$0xf]  ;;  %v3213_v51 = vor.u32 %v4056_v43, %v3212_v42 }
  0x3e   :  { %v3988_v50 = vld [vmem:[#allocation7 + $0x14c] sm:$0xf0]  ;;  %v3068_v52 = vld [vmem:[#allocation7 + $0x240] sm:$0xf]  ;;  %v2813_v56 = vor.u32 %v3956_v47, %v2812_v46 }
  0x3f   :  { %1951 = vmatpush.bf16.msra.mxu2 %v3101_v37  ;;  %1965 = vmatpush.bf16.msra.mxu3 %v3229_v39  ;;  %v4020_v53 = vld [vmem:[#allocation7 + $0x24c] sm:$0xf0]  ;;  %v3196_v54 = vld [vmem:[#allocation7 + $0x340] sm:$0xf]  ;;  %v2941_v26 = vor.u32 %v3988_v50, %v2940_v48 }
  0x40   :  { %v4052_v55 = vld [vmem:[#allocation7 + $0x34c] sm:$0xf0]  ;;  %v2796_v57 = vld [vmem:[#allocation7 + $0x20] sm:$0xf]  ;;  %v3069_v60 = vor.u32 %v4020_v53, %v3068_v52 }
  0x41   :  { %1924 = vmatpush.bf16.msra.mxu0 %v2829_v44  ;;  %1938 = vmatpush.bf16.msra.mxu1 %v2957_v45  ;;  %v3952_v58 = vld [vmem:[#allocation7 + $0x2c] sm:$0xf0]  ;;  %v2924_v59 = vld [vmem:[#allocation7 + $0x120] sm:$0xf]  ;;  %v3197_v62 = vor.u32 %v4052_v55, %v3196_v54 }
  0x42   :  { %v3984_v61 = vld [vmem:[#allocation7 + $0x12c] sm:$0xf0]  ;;  %v3052_v63 = vld [vmem:[#allocation7 + $0x220] sm:$0xf]  ;;  %v2797_v3 = vor.u32 %v3952_v58, %v2796_v57 }
  0x43   :  { %1952 = vmatpush.bf16.msra.mxu2 %v3085_v49  ;;  %1966 = vmatpush.bf16.msra.mxu3 %v3213_v51  ;;  %v4016_v0 = vld [vmem:[#allocation7 + $0x22c] sm:$0xf0]  ;;  %v3180_v1 = vld [vmem:[#allocation7 + $0x320] sm:$0xf]  ;;  %v2925_v6 = vor.u32 %v3984_v61, %v2924_v59 }
  0x44   :  { %v4048_v2 = vld [vmem:[#allocation7 + $0x32c] sm:$0xf0]  ;;  %v2780_v4 = vld [vmem:[#allocation7] sm:$0xf]  ;;  %v3053_v10 = vor.u32 %v4016_v0, %v3052_v63 }
  0x45   :  { %1925 = vmatpush.bf16.msra.mxu0 %v2813_v56  ;;  %v3948_v5 = vld [vmem:[#allocation7 + $0xc] sm:$0xf0]  ;;  %1939 = vmatpush.bf16.msra.mxu1 %v2941_v26  ;;  %v2908_v7 = vld [vmem:[#allocation7 + $0x100] sm:$0xf]  ;;  %v3181_v14 = vor.u32 %v4048_v2, %v3180_v1 }
  0x46   :  { %v3980_v8 = vld [vmem:[#allocation7 + $0x10c] sm:$0xf0]  ;;  %v3404_v9 = vld [vmem:[#allocation7 + $0x4e0] sm:$0xf]  ;;  %v2781_v18 = vor.u32 %v3948_v5, %v2780_v4 }
  0x47   :  { %1953 = vmatpush.bf16.msra.mxu2 %v3069_v60  ;;  %1967 = vmatpush.bf16.msra.mxu3 %v3197_v62  ;;  %v4104_v11 = vld [vmem:[#allocation7 + $0x4ec] sm:$0xf0]  ;;  %v3532_v12 = vld [vmem:[#allocation7 + $0x5e0] sm:$0xf]  ;;  %v2909_v22 = vor.u32 %v3980_v8, %v2908_v7 }
  0x48   :  { %v4136_v13 = vld [vmem:[#allocation7 + $0x5ec] sm:$0xf0]  ;;  %v3036_v15 = vld [vmem:[#allocation7 + $0x200] sm:$0xf]  ;;  %v3405_v23 = vor.u32 %v4104_v11, %v3404_v9 }
  0x49   :  { %v4012_v16 = vld [vmem:[#allocation7 + $0x20c] sm:$0xf0]  ;;  %v3164_v17 = vld [vmem:[#allocation7 + $0x300] sm:$0xf]  ;;  %1926 = vmatpush.bf16.msra.mxu0 %v2797_v3  ;;  %1940 = vmatpush.bf16.msra.mxu1 %v2925_v6  ;;  %v3533_v27 = vor.u32 %v4136_v13, %v3532_v12 }
  0x4a   :  { %v4044_v19 = vld [vmem:[#allocation7 + $0x30c] sm:$0xf0]  ;;  %v3660_v20 = vld [vmem:[#allocation7 + $0x6e0] sm:$0xf]  ;;  %v3037_v30 = vor.u32 %v4012_v16, %v3036_v15 }
  0x4b   :  { %v4168_v21 = vld [vmem:[#allocation7 + $0x6ec] sm:$0xf0]  ;;  %1954 = vmatpush.bf16.msra.mxu2 %v3053_v10  ;;  %v3788_v24 = vld [vmem:[#allocation7 + $0x7e0] sm:$0xf]  ;;  %1968 = vmatpush.bf16.msra.mxu3 %v3181_v14  ;;  %v3165_v33 = vor.u32 %v4044_v19, %v3164_v17 }
  0x4c   :  { %v4200_v25 = vld [vmem:[#allocation7 + $0x7ec] sm:$0xf0]  ;;  %v3388_v28 = vld [vmem:[#allocation7 + $0x4c0] sm:$0xf]  ;;  %v3661_v34 = vor.u32 %v4168_v21, %v3660_v20 }
  0x4d   :  { %v4100_v29 = vld [vmem:[#allocation7 + $0x4cc] sm:$0xf0]  ;;  %v3516_v31 = vld [vmem:[#allocation7 + $0x5c0] sm:$0xf]  ;;  %1927 = vmatpush.bf16.msra.mxu0 %v2781_v18  ;;  %v3789_v35 = vor.u32 %v4200_v25, %v3788_v24  ;;  %1941 = vmatpush.bf16.msra.mxu1 %v2909_v22 }
  0x4e   :  { %v4132_v32 = vld [vmem:[#allocation7 + $0x5cc] sm:$0xf0]  ;;  %v3644_v36 = vld [vmem:[#allocation7 + $0x6c0] sm:$0xf]  ;;  %v3389_v38 = vor.u32 %v4100_v29, %v3388_v28 }
  0x4f   :  { %v4164_v37 = vld [vmem:[#allocation7 + $0x6cc] sm:$0xf0]  ;;  %v3772_v39 = vld [vmem:[#allocation7 + $0x7c0] sm:$0xf]  ;;  %v3517_v41 = vor.u32 %v4132_v32, %v3516_v31  ;;  %1955 = vmatpush.bf16.msra.mxu2 %v3037_v30  ;;  %1969 = vmatpush.bf16.msra.mxu3 %v3165_v33 }
  0x50   :  { %v4196_v40 = vld [vmem:[#allocation7 + $0x7cc] sm:$0xf0]  ;;  %v3372_v42 = vld [vmem:[#allocation7 + $0x4a0] sm:$0xf]  ;;  %v3645_v46 = vor.u32 %v4164_v37, %v3644_v36 }
  0x51   :  { %1976 = vmatpush.bf16.msrb.mxu0 %v3405_v23  ;;  %1990 = vmatpush.bf16.msrb.mxu1 %v3533_v27  ;;  %v4096_v43 = vld [vmem:[#allocation7 + $0x4ac] sm:$0xf0]  ;;  %v3500_v44 = vld [vmem:[#allocation7 + $0x5a0] sm:$0xf]  ;;  %v3773_v47 = vor.u32 %v4196_v40, %v3772_v39 }
  0x52   :  { %v4128_v45 = vld [vmem:[#allocation7 + $0x5ac] sm:$0xf0]  ;;  %v3373_v48 = vor.u32 %v4096_v43, %v3372_v42  ;;  %v3356_v50 = vld [vmem:[#allocation7 + $0x480] sm:$0xf] }
  0x53   :  { %2004 = vmatpush.bf16.msrb.mxu2 %v3661_v34  ;;  %2018 = vmatpush.bf16.msrb.mxu3 %v3789_v35  ;;  %v3501_v49 = vor.u32 %v4128_v45, %v3500_v44  ;;  %v4092_v51 = vld [vmem:[#allocation7 + $0x48c] sm:$0xf0]  ;;  %v3484_v52 = vld [vmem:[#allocation7 + $0x580] sm:$0xf] }
  0x54   :  { %v4124_v53 = vld [vmem:[#allocation7 + $0x58c] sm:$0xf0]  ;;  %v3357_v54 = vor.u32 %v4092_v51, %v3356_v50  ;;  %v3628_v56 = vld [vmem:[#allocation7 + $0x6a0] sm:$0xf] }
  0x55   :  { %1977 = vmatpush.bf16.msrb.mxu0 %v3389_v38  ;;  %1991 = vmatpush.bf16.msrb.mxu1 %v3517_v41  ;;  %v3485_v55 = vor.u32 %v4124_v53, %v3484_v52  ;;  %v4160_v26 = vld [vmem:[#allocation7 + $0x6ac] sm:$0xf0]  ;;  %v3756_v57 = vld [vmem:[#allocation7 + $0x7a0] sm:$0xf]  ;;  %v4491_v52 = vld [vmem:[#allocation6] sm:$0xff] }
  0x56   :  { %v3629_v58 = vor.u32 %v4160_v26, %v3628_v56  ;;  %v4192_v59 = vld [vmem:[#allocation7 + $0x7ac] sm:$0xf0]  ;;  %v3340_v61 = vld [vmem:[#allocation7 + $0x460] sm:$0xf]  ;;  %v139_v56 = vperm.slane %v4491_v52, 1 }
  0x57   :  { %2005 = vmatpush.bf16.msrb.mxu2 %v3645_v46  ;;  %2019 = vmatpush.bf16.msrb.mxu3 %v3773_v47  ;;  %v3757_v60 = vor.u32 %v4192_v59, %v3756_v57  ;;  %v4088_v62 = vld [vmem:[#allocation7 + $0x46c] sm:$0xf0]  ;;  %v3468_v63 = vld [vmem:[#allocation7 + $0x560] sm:$0xf] }
  0x58   :  { %v3341_v0 = vor.u32 %v4088_v62, %v3340_v61  ;;  %v4120_v1 = vld [vmem:[#allocation7 + $0x56c] sm:$0xf0]  ;;  %v3612_v3 = vld [vmem:[#allocation7 + $0x680] sm:$0xf] }
  0x59   :  { %1978 = vmatpush.bf16.msrb.mxu0 %v3373_v48  ;;  %1992 = vmatpush.bf16.msrb.mxu1 %v3501_v49  ;;  %v3469_v2 = vor.u32 %v4120_v1, %v3468_v63  ;;  %v4156_v4 = vld [vmem:[#allocation7 + $0x68c] sm:$0xf0]  ;;  %v3740_v6 = vld [vmem:[#allocation7 + $0x780] sm:$0xf]  ;;  %v2894_v1 = vld [vmem:[#allocation7 + $0xf0] sm:$0xf0] }
  0x5a   :  { %v3613_v5 = vor.u32 %v4156_v4, %v3612_v3  ;;  %v4188_v7 = vld [vmem:[#allocation7 + $0x78c] sm:$0xf0]  ;;  %v3324_v9 = vld [vmem:[#allocation7 + $0x440] sm:$0xf]  ;;  %v140_v3 = vperm.slane %v4491_v52, 2 }
  0x5b   :  { %2006 = vmatpush.bf16.msrb.mxu2 %v3629_v58  ;;  %2020 = vmatpush.bf16.msrb.mxu3 %v3757_v60  ;;  %v3741_v8 = vor.u32 %v4188_v7, %v3740_v6  ;;  %v4084_v10 = vld [vmem:[#allocation7 + $0x44c] sm:$0xf0]  ;;  %v3452_v11 = vld [vmem:[#allocation7 + $0x540] sm:$0xf]  ;;  %v3022_v6 = vld [vmem:[#allocation7 + $0x1f0] sm:$0xf0] }
  0x5c   :  { %v3325_v12 = vor.u32 %v4084_v10, %v3324_v9  ;;  %v4116_v13 = vld [vmem:[#allocation7 + $0x54c] sm:$0xf0]  ;;  %v3596_v15 = vld [vmem:[#allocation7 + $0x660] sm:$0xf]  ;;  %v141_v7 = vperm.slane %v4491_v52, 3 }
  0x5d   :  { %1979 = vmatpush.bf16.msrb.mxu0 %v3357_v54  ;;  %1993 = vmatpush.bf16.msrb.mxu1 %v3485_v55  ;;  %v3453_v14 = vor.u32 %v4116_v13, %v3452_v11  ;;  %v4152_v16 = vld [vmem:[#allocation7 + $0x66c] sm:$0xf0]  ;;  %v3724_v17 = vld [vmem:[#allocation7 + $0x760] sm:$0xf]  ;;  %v138_v54 = vperm.slane %v4491_v52, 0 }
  0x5e   :  { %v3597_v18 = vor.u32 %v4152_v16, %v3596_v15  ;;  %v4184_v19 = vld [vmem:[#allocation7 + $0x76c] sm:$0xf0]  ;;  %v3308_v21 = vld [vmem:[#allocation7 + $0x420] sm:$0xf]  ;;  %v3970_v13 = vld [vmem:[#allocation7 + $0xc4] sm:$0xf] }
  0x5f   :  { %2007 = vmatpush.bf16.msrb.mxu2 %v3613_v5  ;;  %2021 = vmatpush.bf16.msrb.mxu3 %v3741_v8  ;;  %v3725_v20 = vor.u32 %v4184_v19, %v3724_v17  ;;  %v4080_v22 = vld [vmem:[#allocation7 + $0x42c] sm:$0xf0]  ;;  %v3436_v24 = vld [vmem:[#allocation7 + $0x520] sm:$0xf]  ;;  %v4006_v5 = vld [vmem:[#allocation7 + $0x1e4] sm:$0xf] }
  0x60   :  { %v3309_v23 = vor.u32 %v4080_v22, %v3308_v21  ;;  %v4112_v25 = vld [vmem:[#allocation7 + $0x52c] sm:$0xf0]  ;;  %v3580_v28 = vld [vmem:[#allocation7 + $0x640] sm:$0xf]  ;;  %v4002_v17 = vld [vmem:[#allocation7 + $0x1c4] sm:$0xf] }
  0x61   :  { %1980 = vmatpush.bf16.msrb.mxu0 %v3341_v0  ;;  %1994 = vmatpush.bf16.msrb.mxu1 %v3469_v2  ;;  %v3437_v27 = vor.u32 %v4112_v25, %v3436_v24  ;;  %v4148_v29 = vld [vmem:[#allocation7 + $0x64c] sm:$0xf0]  ;;  %v3708_v30 = vld [vmem:[#allocation7 + $0x740] sm:$0xf]  ;;  %v3974_v0 = vld [vmem:[#allocation7 + $0xe4] sm:$0xf] }
  0x62   :  { %v3581_v31 = vor.u32 %v4148_v29, %v3580_v28  ;;  %v4180_v32 = vld [vmem:[#allocation7 + $0x74c] sm:$0xf0]  ;;  %v3292_v34 = vld [vmem:[#allocation7 + $0x400] sm:$0xf]  ;;  %v2897_v10 = vor.u32 %v3974_v0, %v2894_v1  ;;  %v4038_v21 = vld [vmem:[#allocation7 + $0x2e4] sm:$0xf] }
  0x63   :  { %2008 = vmatpush.bf16.msrb.mxu2 %v3597_v18  ;;  %2022 = vmatpush.bf16.msrb.mxu3 %v3725_v20  ;;  %v3709_v33 = vor.u32 %v4180_v32, %v3708_v30  ;;  %v4076_v35 = vld [vmem:[#allocation7 + $0x40c] sm:$0xf0]  ;;  %v3420_v36 = vld [vmem:[#allocation7 + $0x500] sm:$0xf]  ;;  %v3006_v18 = vld [vmem:[#allocation7 + $0x1d0] sm:$0xf0] }
  0x64   :  { %v3293_v37 = vor.u32 %v4076_v35, %v3292_v34  ;;  %v4108_v38 = vld [vmem:[#allocation7 + $0x50c] sm:$0xf0]  ;;  %v3564_v40 = vld [vmem:[#allocation7 + $0x620] sm:$0xf]  ;;  %v142_v24 = vperm.slane %v4491_v52, 4 }
  0x65   :  { %1981 = vmatpush.bf16.msrb.mxu0 %v3325_v12  ;;  %1995 = vmatpush.bf16.msrb.mxu1 %v3453_v14  ;;  %v3421_v39 = vor.u32 %v4108_v38, %v3420_v36  ;;  %v4144_v41 = vld [vmem:[#allocation7 + $0x62c] sm:$0xf0]  ;;  %v3692_v42 = vld [vmem:[#allocation7 + $0x720] sm:$0xf]  ;;  %v3025_v12 = vor.u32 %v4006_v5, %v3022_v6  ;;  %v2878_v14 = vld [vmem:[#allocation7 + $0xd0] sm:$0xf0] }
  0x66   :  { %v4176_v43 = vld [vmem:[#allocation7 + $0x72c] sm:$0xf0]  ;;  %v3565_v44 = vor.u32 %v4144_v41, %v3564_v40  ;;  %v3548_v46 = vld [vmem:[#allocation7 + $0x600] sm:$0xf]  ;;  %v2881_v28 = vor.u32 %v3970_v13, %v2878_v14  ;;  %v3150_v29 = vld [vmem:[#allocation7 + $0x2f0] sm:$0xf0] }
  0x67   :  { %2009 = vmatpush.bf16.msrb.mxu2 %v3581_v31  ;;  %2023 = vmatpush.bf16.msrb.mxu3 %v3709_v33  ;;  %v3693_v45 = vor.u32 %v4176_v43, %v3692_v42  ;;  %v4140_v47 = vld [vmem:[#allocation7 + $0x60c] sm:$0xf0]  ;;  %v3676_v49 = vld [vmem:[#allocation7 + $0x700] sm:$0xf]  ;;  %v4070_v30 = vld [vmem:[#allocation7 + $0x3e4] sm:$0xf]  ;;  %v3009_v33 = vor.u32 %v4002_v17, %v3006_v18  ;;  %v3153_v43 = vor.u32 %v4038_v21, %v3150_v29 }
  0x68   :  { %v3549_v48 = vor.u32 %v4140_v47, %v3548_v46  ;;  %v4172_v50 = vld [vmem:[#allocation7 + $0x70c] sm:$0xf0]  ;;  %v3278_v34 = vld [vmem:[#allocation7 + $0x3f0] sm:$0xf0]  ;;  %v3966_v35 = vld [vmem:[#allocation7 + $0xa4] sm:$0xf] }
  0x69   :  { %1982 = vmatpush.bf16.msrb.mxu0 %v3309_v23  ;;  %1996 = vmatpush.bf16.msrb.mxu1 %v3437_v27  ;;  %v3677_v51 = vor.u32 %v4172_v50, %v3676_v49  ;;  %v143_v27 = vperm.slane %v4491_v52, 5  ;;  %v2862_v36 = vld [vmem:[#allocation7 + $0xb0] sm:$0xf0]  ;;  %v4034_v47 = vld [vmem:[#allocation7 + $0x2c4] sm:$0xf] }
  0x6a   :  { %v2990_v40 = vld [vmem:[#allocation7 + $0x1b0] sm:$0xf0]  ;;  %v2865_v46 = vor.u32 %v3966_v35, %v2862_v36  ;;  %v4066_v49 = vld [vmem:[#allocation7 + $0x3c4] sm:$0xf] }
  0x6b   :  { %2010 = vmatpush.bf16.msrb.mxu2 %v3565_v44  ;;  %2024 = vmatpush.bf16.msrb.mxu3 %v3693_v45  ;;  %v3281_v45 = vor.u32 %v4070_v30, %v3278_v34  ;;  %v3246_v5 = vld [vmem:[#allocation7 + $0x3b0] sm:$0xf0]  ;;  %v3990_v17 = vld [vmem:[#allocation7 + $0x164] sm:$0xf] }
  0x6c   :  { %v2830_v13 = vld [vmem:[#allocation7 + $0x70] sm:$0xf0]  ;;  %v3986_v35 = vld [vmem:[#allocation7 + $0x144] sm:$0xf] }
  0x6d   :  { %1983 = vmatpush.bf16.msrb.mxu0 %v3293_v37  ;;  %1997 = vmatpush.bf16.msrb.mxu1 %v3421_v39  ;;  %v3998_v39 = vld [vmem:[#allocation7 + $0x1a4] sm:$0xf]  ;;  %v2958_v18 = vld [vmem:[#allocation7 + $0x170] sm:$0xf0] }
  0x6e   :  { %v2961_v30 = vor.u32 %v3990_v17, %v2958_v18  ;;  %v2814_v34 = vld [vmem:[#allocation7 + $0x50] sm:$0xf0]  ;;  %v4014_v17 = vld [vmem:[#allocation7 + $0x224] sm:$0xf] }
  0x6f   :  { %2011 = vmatpush.bf16.msrb.mxu2 %v3549_v48  ;;  %2025 = vmatpush.bf16.msrb.mxu3 %v3677_v51  ;;  %v3134_v48 = vld [vmem:[#allocation7 + $0x2d0] sm:$0xf0] }
  0x70   :  { %v2942_v36 = vld [vmem:[#allocation7 + $0x150] sm:$0xf0] }
  0x71   :  { %v3054_v18 = vld [vmem:[#allocation7 + $0x230] sm:$0xf0] }
  0xa5   :  { %v247_v53 = vpop.f32.mrf.mxu0  ;;  %v261_v55 = vpop.f32.mrf.mxu1 }
  0xa6   :  { %v248_v26 = vadd.f32 %v247_v53, %v138_v54  ;;  %v262_v57 = vadd.f32 %v261_v55, %v139_v56  ;;  %v2993_v53 = vor.u32 %v3998_v39, %v2990_v40  ;;  %v3962_v55 = vld [vmem:[#allocation7 + $0x84] sm:$0xf]  ;;  %v3086_v40 = vld [vmem:[#allocation7 + $0x270] sm:$0xf0] }
  0xa7   :  { %v4022_v39 = vld [vmem:[#allocation7 + $0x264] sm:$0xf] }
  0xa8   :  { %v350_v61 = vmax.f32 %v248_v26, 0.0  ;;  %v351_v2 = vmax.f32 %v262_v57, 0.0  ;;  %v3994_v57 = vld [vmem:[#allocation7 + $0x184] sm:$0xf] }
  0xad   :  { %v275_v58 = vpop.f32.mrf.mxu2  ;;  %v289_v59 = vpop.f32.mrf.mxu3 }
  0xae   :  { %v249_v60 = vpop.f32.mrf.mxu0  ;;  %v263_v63 = vpop.f32.mrf.mxu1  ;;  %v276_v15 = vadd.f32 %v275_v58, %v140_v3  ;;  %v290_v19 = vadd.f32 %v289_v59, %v141_v7  ;;  %v2974_v58 = vld [vmem:[#allocation7 + $0x190] sm:$0xf0]  ;;  %v144_v59 = vperm.slane %v4491_v52, 6 }
  0xaf   :  { %v250_v62 = vadd.f32 %v249_v60, %v138_v54  ;;  %v264_v4 = vadd.f32 %v263_v63, %v139_v56  ;;  %v3262_v54 = vld [vmem:[#allocation7 + $0x3d0] sm:$0xf0] }
  0xb0   :  { %v352_v37 = vmax.f32 %v276_v15, 0.0  ;;  %v353_v41 = vmax.f32 %v290_v19, 0.0  ;;  %v2846_v56 = vld [vmem:[#allocation7 + $0x90] sm:$0xf0]  ;;  %v3265_v1 = vor.u32 %v4066_v49, %v3262_v54  ;;  %v3950_v54 = vld [vmem:[#allocation7 + $0x24] sm:$0xf] }
  0xb1   :  { %v358_v8 = vmax.f32 %v250_v62, 0.0  ;;  %v359_v9 = vmax.f32 %v264_v4, 0.0  ;;  %v4030_v62 = vld [vmem:[#allocation7 + $0x2a4] sm:$0xf] }
  0xb2   :  { %v4062_v4 = vld [vmem:[#allocation7 + $0x3a4] sm:$0xf] }
  0xb3   :  { %v4497_v11 = vpack.c.bf16 %v358_v8, %v350_v61  ;;  %v4499_v16 = vpack.c.bf16 %v359_v9, %v351_v2  ;;  %v3137_v61 = vor.u32 %v4034_v47, %v3134_v48  ;;  %v2849_v2 = vor.u32 %v3962_v55, %v2846_v56  ;;  %v3214_v47 = vld [vmem:[#allocation7 + $0x370] sm:$0xf0] }
  0xb4   :  { %v2798_v55 = vld [vmem:[#allocation7 + $0x30] sm:$0xf0] }
  0xb5   :  { %v277_v20 = vpop.f32.mrf.mxu2  ;;  %1928 = vmatmul.bf16.vlgmr.msra.gmra.mxu0 %v4497_v11  ;;  %v291_v23 = vpop.f32.mrf.mxu3  ;;  %1942 = vmatmul.bf16.vlgmr.msra.gmra.mxu1 %v4499_v16 }
  0xb6   :  { %v278_v22 = vadd.f32 %v277_v20, %v140_v3  ;;  %2032 = vmatpush.bf16.msra.mxu0 %v2897_v10  ;;  %v303_v25 = vpop.f32.mrf.mxu0  ;;  %v292_v31 = vadd.f32 %v291_v23, %v141_v7  ;;  %2046 = vmatpush.bf16.msra.mxu1 %v3025_v12  ;;  %v317_v32 = vpop.f32.mrf.mxu1  ;;  %v3118_v3 = vld [vmem:[#allocation7 + $0x2b0] sm:$0xf0]  ;;  %v145_v7 = vperm.slane %v4491_v52, 7  ;;  %v2977_v10 = vor.u32 %v3994_v57, %v2974_v58  ;;  %v3958_v12 = vld [vmem:[#allocation7 + $0x64] sm:$0xf] }
  0xb7   :  { %v304_v51 = vadd.f32 %v303_v25, %v142_v24  ;;  %v318_v26 = vadd.f32 %v317_v32, %v143_v27  ;;  %v3121_v20 = vor.u32 %v4030_v62, %v3118_v3  ;;  %v3249_v23 = vor.u32 %v4062_v4, %v3246_v5  ;;  %v4026_v25 = vld [vmem:[#allocation7 + $0x284] sm:$0xf]  ;;  %v3102_v52 = vld [vmem:[#allocation7 + $0x290] sm:$0xf0] }
  0xb8   :  { %v360_v38 = vmax.f32 %v278_v22, 0.0  ;;  %v361_v42 = vmax.f32 %v292_v31, 0.0  ;;  %v2833_v29 = vor.u32 %v3958_v12, %v2830_v13  ;;  %v4058_v31 = vld [vmem:[#allocation7 + $0x384] sm:$0xf]  ;;  %v2926_v57 = vld [vmem:[#allocation7 + $0x130] sm:$0xf0] }
  0xb9   :  { %v354_v6 = vmax.f32 %v304_v51, 0.0  ;;  %v355_v14 = vmax.f32 %v318_v26, 0.0  ;;  %v3954_v32 = vld [vmem:[#allocation7 + $0x44] sm:$0xf]  ;;  %v3198_v4 = vld [vmem:[#allocation7 + $0x350] sm:$0xf0] }
  0xba   :  { %v4505_v44 = vpack.c.bf16 %v360_v38, %v352_v37  ;;  %2033 = vmatpush.bf16.msra.mxu0 %v2881_v28  ;;  %v4507_v50 = vpack.c.bf16 %v361_v42, %v353_v41  ;;  %2047 = vmatpush.bf16.msra.mxu1 %v3009_v33  ;;  %v3105_v38 = vor.u32 %v4026_v25, %v3102_v52  ;;  %v3982_v26 = vld [vmem:[#allocation7 + $0x124] sm:$0xf]  ;;  %v3406_v12 = vld [vmem:[#allocation7 + $0x4f0] sm:$0xf0] }
  0xbb   :  { %v2817_v51 = vor.u32 %v3954_v32, %v2814_v34  ;;  %v4018_v62 = vld [vmem:[#allocation7 + $0x244] sm:$0xf]  ;;  %v2929_v3 = vor.u32 %v3982_v26, %v2926_v57  ;;  %v3038_v34 = vld [vmem:[#allocation7 + $0x210] sm:$0xf0] }
  0xbc   :  { %1956 = vmatmul.bf16.vlgmr.msra.gmra.mxu2 %v4505_v44  ;;  %1970 = vmatmul.bf16.vlgmr.msra.gmra.mxu3 %v4507_v50  ;;  %v3946_v5 = vld [vmem:[#allocation7 + $0x4] sm:$0xf] }
  0xbd   :  { %2060 = vmatpush.bf16.msra.mxu2 %v3153_v43  ;;  %v331_v60 = vpop.f32.mrf.mxu2  ;;  %2074 = vmatpush.bf16.msra.mxu3 %v3281_v45  ;;  %v345_v63 = vpop.f32.mrf.mxu3  ;;  %v4134_v13 = vld [vmem:[#allocation7 + $0x5e4] sm:$0xf] }
  0xbe   :  { %2034 = vmatpush.bf16.msra.mxu0 %v2865_v46  ;;  %v305_v0 = vpop.f32.mrf.mxu0  ;;  %2048 = vmatpush.bf16.msra.mxu1 %v2993_v53  ;;  %v319_v9 = vpop.f32.mrf.mxu1  ;;  %v332_v21 = vadd.f32 %v331_v60, %v144_v59  ;;  %v346_v28 = vadd.f32 %v345_v63, %v145_v7  ;;  %v4054_v46 = vld [vmem:[#allocation7 + $0x364] sm:$0xf]  ;;  %v2945_v53 = vor.u32 %v3986_v35, %v2942_v36  ;;  %v3070_v63 = vld [vmem:[#allocation7 + $0x250] sm:$0xf0] }
  0xbf   :  { %v306_v8 = vadd.f32 %v305_v0, %v142_v24  ;;  %v320_v15 = vadd.f32 %v319_v9, %v143_v27  ;;  %v3230_v27 = vld [vmem:[#allocation7 + $0x390] sm:$0xf0]  ;;  %v4050_v0 = vld [vmem:[#allocation7 + $0x344] sm:$0xf] }
  0xc0   :  { %v356_v41 = vmax.f32 %v332_v21, 0.0  ;;  %v3233_v45 = vor.u32 %v4058_v31, %v3230_v27  ;;  %v357_v48 = vmax.f32 %v346_v28, 0.0  ;;  %v4102_v9 = vld [vmem:[#allocation7 + $0x4e4] sm:$0xf]  ;;  %v3057_v28 = vor.u32 %v4014_v17, %v3054_v18  ;;  %v3518_v31 = vld [vmem:[#allocation7 + $0x5d0] sm:$0xf0] }
  0xc1   :  { %v362_v19 = vmax.f32 %v306_v8, 0.0  ;;  %2061 = vmatpush.bf16.msra.mxu2 %v3137_v61  ;;  %v363_v22 = vmax.f32 %v320_v15, 0.0  ;;  %2075 = vmatpush.bf16.msra.mxu3 %v3265_v1  ;;  %v3217_v61 = vor.u32 %v4054_v46, %v3214_v47  ;;  %v2910_v8 = vld [vmem:[#allocation7 + $0x110] sm:$0xf0]  ;;  %v3201_v15 = vor.u32 %v4050_v0, %v3198_v4  ;;  %v4046_v21 = vld [vmem:[#allocation7 + $0x324] sm:$0xf] }
  0xc2   :  { %2035 = vmatpush.bf16.msra.mxu0 %v2849_v2  ;;  %2049 = vmatpush.bf16.msra.mxu1 %v2977_v10  ;;  %v2801_v2 = vor.u32 %v3950_v54, %v2798_v55  ;;  %v3073_v10 = vor.u32 %v4018_v62, %v3070_v63  ;;  %v4098_v52 = vld [vmem:[#allocation7 + $0x4c4] sm:$0xf]  ;;  %v3166_v36 = vld [vmem:[#allocation7 + $0x310] sm:$0xf0] }
  0xc3   :  { %v4513_v24 = vpack.c.bf16 %v362_v19, %v354_v6  ;;  %v4515_v33 = vpack.c.bf16 %v363_v22, %v355_v14  ;;  %v2782_v6 = vld [vmem:[#allocation7 + $0x10] sm:$0xf0]  ;;  %v4010_v32 = vld [vmem:[#allocation7 + $0x204] sm:$0xf] }
  0xc4   :  { %v3534_v14 = vld [vmem:[#allocation7 + $0x5f0] sm:$0xf0]  ;;  %v2785_v19 = vor.u32 %v3946_v5, %v2782_v6  ;;  %v4042_v35 = vld [vmem:[#allocation7 + $0x304] sm:$0xf] }
  0xc5   :  { %2062 = vmatpush.bf16.msra.mxu2 %v3121_v20  ;;  %v333_v37 = vpop.f32.mrf.mxu2  ;;  %1984 = vmatmul.bf16.vlgmr.msrb.gmra.mxu0 %v4513_v24  ;;  %v347_v43 = vpop.f32.mrf.mxu3  ;;  %v3182_v22 = vld [vmem:[#allocation7 + $0x330] sm:$0xf0]  ;;  %v3537_v25 = vor.u32 %v4134_v13, %v3534_v14  ;;  %v4126_v47 = vld [vmem:[#allocation7 + $0x5a4] sm:$0xf] }
  0xc6   :  { %2076 = vmatpush.bf16.msra.mxu3 %v3249_v23  ;;  %v334_v42 = vadd.f32 %v333_v37, %v144_v59  ;;  %1998 = vmatmul.bf16.vlgmr.msrb.gmra.mxu1 %v4515_v33  ;;  %v348_v49 = vadd.f32 %v347_v43, %v145_v7  ;;  %v3089_v59 = vor.u32 %v4022_v39, %v3086_v40  ;;  %v3978_v7 = vld [vmem:[#allocation7 + $0x104] sm:$0xf]  ;;  %v3374_v46 = vld [vmem:[#allocation7 + $0x4b0] sm:$0xf0] }
  0xc7   :  { %2036 = vmatpush.bf16.msra.mxu0 %v2833_v29  ;;  %2050 = vmatpush.bf16.msra.mxu1 %v2961_v30  ;;  %v2913_v20 = vor.u32 %v3978_v7, %v2910_v8  ;;  %v3409_v23 = vor.u32 %v4102_v9, %v3406_v12  ;;  %v3390_v29 = vld [vmem:[#allocation7 + $0x4d0] sm:$0xf0]  ;;  %v4130_v30 = vld [vmem:[#allocation7 + $0x5c4] sm:$0xf]  ;;  %v3185_v27 = vor.u32 %v4046_v21, %v3182_v22 }
  0xc8   :  { %v364_v56 = vmax.f32 %v334_v42, 0.0  ;;  %v365_v58 = vmax.f32 %v348_v49, 0.0  ;;  %v4166_v37 = vld [vmem:[#allocation7 + $0x6e4] sm:$0xf]  ;;  %v3393_v39 = vor.u32 %v4098_v52, %v3390_v29  ;;  %v3521_v40 = vor.u32 %v4130_v30, %v3518_v31  ;;  %v3790_v42 = vld [vmem:[#allocation7 + $0x7f0] sm:$0xf0] }
  0xc9   :  { %2063 = vmatpush.bf16.msra.mxu2 %v3105_v38  ;;  %v3662_v38 = vld [vmem:[#allocation7 + $0x6f0] sm:$0xf0]  ;;  %v4094_v43 = vld [vmem:[#allocation7 + $0x4a4] sm:$0xf]  ;;  %v3169_v49 = vor.u32 %v4042_v35, %v3166_v36 }
  0xca   :  { %v4519_v60 = vpack.c.bf16 %v364_v56, %v356_v41  ;;  %2077 = vmatpush.bf16.msra.mxu3 %v3233_v45  ;;  %v4521_v1 = vpack.c.bf16 %v365_v58, %v357_v48  ;;  %v4198_v41 = vld [vmem:[#allocation7 + $0x7e4] sm:$0xf]  ;;  %v3041_v45 = vor.u32 %v4010_v32, %v3038_v34  ;;  %v3502_v48 = vld [vmem:[#allocation7 + $0x5b0] sm:$0xf0]  ;;  %v3377_v56 = vor.u32 %v4094_v43, %v3374_v46 }
  0xcb   :  { %2037 = vmatpush.bf16.msra.mxu0 %v2817_v51  ;;  %2051 = vmatpush.bf16.msra.mxu1 %v2945_v53  ;;  %v3665_v51 = vor.u32 %v4166_v37, %v3662_v38  ;;  %v3793_v53 = vor.u32 %v4198_v41, %v3790_v42  ;;  %v4162_v54 = vld [vmem:[#allocation7 + $0x6c4] sm:$0xf]  ;;  %v3646_v55 = vld [vmem:[#allocation7 + $0x6d0] sm:$0xf0]  ;;  %v3505_v26 = vor.u32 %v4126_v47, %v3502_v48 }
  0xcc   :  { %2012 = vmatmul.bf16.vlgmr.msrb.gmra.mxu2 %v4519_v60  ;;  %2026 = vmatmul.bf16.vlgmr.msrb.gmra.mxu3 %v4521_v1  ;;  %v4194_v57 = vld [vmem:[#allocation7 + $0x7c4] sm:$0xf]  ;;  %v3774_v58 = vld [vmem:[#allocation7 + $0x7d0] sm:$0xf0]  ;;  %v3649_v0 = vor.u32 %v4162_v54, %v3646_v55 }
  0xcd   :  { %2064 = vmatpush.bf16.msra.mxu2 %v3089_v59  ;;  %v4090_v59 = vld [vmem:[#allocation7 + $0x484] sm:$0xf]  ;;  %v3486_v63 = vld [vmem:[#allocation7 + $0x590] sm:$0xf0] }
  0xce   :  { %2078 = vmatpush.bf16.msra.mxu3 %v3217_v61  ;;  %v3358_v61 = vld [vmem:[#allocation7 + $0x490] sm:$0xf0]  ;;  %v4122_v62 = vld [vmem:[#allocation7 + $0x584] sm:$0xf] }
  0xcf   :  { %2038 = vmatpush.bf16.msra.mxu0 %v2801_v2  ;;  %2052 = vmatpush.bf16.msra.mxu1 %v2929_v3  ;;  %v3777_v2 = vor.u32 %v4194_v57, %v3774_v58  ;;  %v4158_v3 = vld [vmem:[#allocation7 + $0x6a4] sm:$0xf]  ;;  %v3630_v4 = vld [vmem:[#allocation7 + $0x6b0] sm:$0xf0]  ;;  %v3361_v5 = vor.u32 %v4090_v59, %v3358_v61  ;;  %v3489_v6 = vor.u32 %v4122_v62, %v3486_v63  ;;  %v3977_v57 = vld [vmem:[#allocation7 + $0xf4] sm:$0xf0] }
  0xd0   :  { %v4190_v7 = vld [vmem:[#allocation7 + $0x7a4] sm:$0xf]  ;;  %v3758_v8 = vld [vmem:[#allocation7 + $0x7b0] sm:$0xf0]  ;;  %v3633_v14 = vor.u32 %v4158_v3, %v3630_v4  ;;  %v3028_v58 = vld [vmem:[#allocation7 + $0x1e8] sm:$0xf] }
  0xd1   :  { %2065 = vmatpush.bf16.msra.mxu2 %v3073_v10  ;;  %v4086_v9 = vld [vmem:[#allocation7 + $0x464] sm:$0xf]  ;;  %v3342_v10 = vld [vmem:[#allocation7 + $0x470] sm:$0xf0]  ;;  %v4009_v59 = vld [vmem:[#allocation7 + $0x1f4] sm:$0xf0] }
  0xd2   :  { %2079 = vmatpush.bf16.msra.mxu3 %v3201_v15  ;;  %v4118_v12 = vld [vmem:[#allocation7 + $0x564] sm:$0xf]  ;;  %v3470_v13 = vld [vmem:[#allocation7 + $0x570] sm:$0xf0]  ;;  %v3761_v15 = vor.u32 %v4190_v7, %v3758_v8  ;;  %v2884_v7 = vld [vmem:[#allocation7 + $0xc8] sm:$0xf] }
  0xd3   :  { %2039 = vmatpush.bf16.msra.mxu0 %v2785_v19  ;;  %2053 = vmatpush.bf16.msra.mxu1 %v2913_v20  ;;  %v4154_v17 = vld [vmem:[#allocation7 + $0x684] sm:$0xf]  ;;  %v3614_v18 = vld [vmem:[#allocation7 + $0x690] sm:$0xf0]  ;;  %v3345_v19 = vor.u32 %v4086_v9, %v3342_v10  ;;  %v3473_v20 = vor.u32 %v4118_v12, %v3470_v13  ;;  %v3973_v9 = vld [vmem:[#allocation7 + $0xd4] sm:$0xf0] }
  0xd4   :  { %v4186_v21 = vld [vmem:[#allocation7 + $0x784] sm:$0xf]  ;;  %v3742_v22 = vld [vmem:[#allocation7 + $0x790] sm:$0xf0]  ;;  %v3617_v29 = vor.u32 %v4154_v17, %v3614_v18  ;;  %v3012_v10 = vld [vmem:[#allocation7 + $0x1c8] sm:$0xf] }
  0xd5   :  { %2066 = vmatpush.bf16.msra.mxu2 %v3057_v28  ;;  %v4114_v52 = vld [vmem:[#allocation7 + $0x544] sm:$0xf]  ;;  %v3454_v28 = vld [vmem:[#allocation7 + $0x550] sm:$0xf0]  ;;  %v3745_v30 = vor.u32 %v4186_v21, %v3742_v22  ;;  %v4005_v12 = vld [vmem:[#allocation7 + $0x1d4] sm:$0xf0]  ;;  %v2885_v21 = vor.u32 %v3973_v9, %v2884_v7 }
  0xd6   :  { %2080 = vmatpush.bf16.msra.mxu3 %v3185_v27  ;;  %2040 = vmatmul.bf16.vlgmr.msra.gmra.mxu0 %v4497_v11  ;;  %v4150_v31 = vld [vmem:[#allocation7 + $0x664] sm:$0xf]  ;;  %v3598_v27 = vld [vmem:[#allocation7 + $0x670] sm:$0xf0]  ;;  %v3457_v34 = vor.u32 %v4114_v52, %v3454_v28  ;;  %v3013_v22 = vor.u32 %v4005_v12, %v3012_v10  ;;  %v2868_v28 = vld [vmem:[#allocation7 + $0xa8] sm:$0xf] }
  0xd7   :  { %2088 = vmatpush.bf16.msrb.mxu0 %v3409_v23  ;;  %2102 = vmatpush.bf16.msrb.mxu1 %v3537_v25  ;;  %v4082_v23 = vld [vmem:[#allocation7 + $0x444] sm:$0xf]  ;;  %v3326_v25 = vld [vmem:[#allocation7 + $0x450] sm:$0xf0]  ;;  %v3601_v41 = vor.u32 %v4150_v31, %v3598_v27  ;;  %v2996_v27 = vld [vmem:[#allocation7 + $0x1a8] sm:$0xf] }
  0xd8   :  { %2054 = vmatmul.bf16.vlgmr.msra.gmra.mxu1 %v4499_v16  ;;  %v3329_v32 = vor.u32 %v4082_v23, %v3326_v25  ;;  %v4182_v35 = vld [vmem:[#allocation7 + $0x764] sm:$0xf]  ;;  %v3726_v36 = vld [vmem:[#allocation7 + $0x770] sm:$0xf0]  ;;  %v3284_v23 = vld [vmem:[#allocation7 + $0x3e8] sm:$0xf] }
  0xd9   :  { %2067 = vmatpush.bf16.msra.mxu2 %v3041_v45  ;;  %v4078_v37 = vld [vmem:[#allocation7 + $0x424] sm:$0xf]  ;;  %v3310_v38 = vld [vmem:[#allocation7 + $0x430] sm:$0xf0]  ;;  %v3729_v42 = vor.u32 %v4182_v35, %v3726_v36  ;;  %v4073_v25 = vld [vmem:[#allocation7 + $0x3f4] sm:$0xf0] }
  0xda   :  { %2081 = vmatpush.bf16.msra.mxu3 %v3169_v49  ;;  %v4146_v43 = vld [vmem:[#allocation7 + $0x644] sm:$0xf]  ;;  %v3582_v45 = vld [vmem:[#allocation7 + $0x650] sm:$0xf0]  ;;  %v3313_v47 = vor.u32 %v4078_v37, %v3310_v38  ;;  %v3140_v35 = vld [vmem:[#allocation7 + $0x2c8] sm:$0xf] }
  0xdb   :  { %2089 = vmatpush.bf16.msrb.mxu0 %v3393_v39  ;;  %2103 = vmatpush.bf16.msrb.mxu1 %v3521_v40  ;;  %v4110_v39 = vld [vmem:[#allocation7 + $0x524] sm:$0xf]  ;;  %v3438_v40 = vld [vmem:[#allocation7 + $0x530] sm:$0xf0]  ;;  %v4037_v36 = vld [vmem:[#allocation7 + $0x2d4] sm:$0xf0] }
  0xdc   :  { %2068 = vmatmul.bf16.vlgmr.msra.gmra.mxu2 %v4505_v44  ;;  %v4178_v46 = vld [vmem:[#allocation7 + $0x744] sm:$0xf]  ;;  %v3441_v48 = vor.u32 %v4110_v39, %v3438_v40  ;;  %v3710_v49 = vld [vmem:[#allocation7 + $0x750] sm:$0xf0]  ;;  %v3268_v38 = vld [vmem:[#allocation7 + $0x3c8] sm:$0xf] }
  0xdd   :  { %2116 = vmatpush.bf16.msrb.mxu2 %v3665_v51  ;;  %2082 = vmatmul.bf16.vlgmr.msra.gmra.mxu3 %v4507_v50  ;;  %v4074_v51 = vld [vmem:[#allocation7 + $0x404] sm:$0xf]  ;;  %v3422_v55 = vld [vmem:[#allocation7 + $0x510] sm:$0xf0]  ;;  %v3713_v61 = vor.u32 %v4178_v46, %v3710_v49  ;;  %v4069_v39 = vld [vmem:[#allocation7 + $0x3d4] sm:$0xf0] }
  0xde   :  { %2130 = vmatpush.bf16.msrb.mxu3 %v3793_v53  ;;  %v3294_v53 = vld [vmem:[#allocation7 + $0x410] sm:$0xf0]  ;;  %v4106_v54 = vld [vmem:[#allocation7 + $0x504] sm:$0xf]  ;;  %v3997_v46 = vld [vmem:[#allocation7 + $0x194] sm:$0xf0] }
  0xdf   :  { %2090 = vmatpush.bf16.msrb.mxu0 %v3377_v56  ;;  %2104 = vmatpush.bf16.msrb.mxu1 %v3505_v26  ;;  %v2900_v56 = vld [vmem:[#allocation7 + $0xe8] sm:$0xf]  ;;  %v3585_v26 = vor.u32 %v4146_v43, %v3582_v45  ;;  %v4142_v62 = vld [vmem:[#allocation7 + $0x624] sm:$0xf]  ;;  %v3566_v63 = vld [vmem:[#allocation7 + $0x630] sm:$0xf0]  ;;  %v3141_v43 = vor.u32 %v4037_v36, %v3140_v35 }
  0xe0   :  { %v4174_v3 = vld [vmem:[#allocation7 + $0x724] sm:$0xf]  ;;  %v3694_v4 = vld [vmem:[#allocation7 + $0x730] sm:$0xf0]  ;;  %v3569_v8 = vor.u32 %v4142_v62, %v3566_v63  ;;  %v2980_v45 = vld [vmem:[#allocation7 + $0x188] sm:$0xf] }
  0xe1   :  { %2117 = vmatpush.bf16.msrb.mxu2 %v3649_v0  ;;  %v3297_v0 = vor.u32 %v4074_v51, %v3294_v53  ;;  %v3697_v13 = vor.u32 %v4174_v3, %v3694_v4  ;;  %v4170_v17 = vld [vmem:[#allocation7 + $0x704] sm:$0xf]  ;;  %v3678_v18 = vld [vmem:[#allocation7 + $0x710] sm:$0xf0]  ;;  %v4033_v49 = vld [vmem:[#allocation7 + $0x2b4] sm:$0xf0] }
  0xe2   :  { %2131 = vmatpush.bf16.msrb.mxu3 %v3777_v2  ;;  %v3425_v2 = vor.u32 %v4106_v54, %v3422_v55  ;;  %v3252_v53 = vld [vmem:[#allocation7 + $0x3a8] sm:$0xf]  ;;  %v4065_v54 = vld [vmem:[#allocation7 + $0x3b4] sm:$0xf0]  ;;  %v2981_v55 = vor.u32 %v3997_v46, %v2980_v45 }
  0xe3   :  { %2091 = vmatpush.bf16.msrb.mxu0 %v3361_v5  ;;  %2105 = vmatpush.bf16.msrb.mxu1 %v3489_v6  ;;  %v2901_v5 = vor.u32 %v3977_v57, %v2900_v56  ;;  %v3029_v6 = vor.u32 %v4009_v59, %v3028_v58  ;;  %v2836_v56 = vld [vmem:[#allocation7 + $0x68] sm:$0xf]  ;;  %v3993_v59 = vld [vmem:[#allocation7 + $0x174] sm:$0xf0] }
  0xe4   :  { %v2964_v58 = vld [vmem:[#allocation7 + $0x168] sm:$0xf]  ;;  %v4029_v63 = vld [vmem:[#allocation7 + $0x294] sm:$0xf0] }
  0xe5   :  { %2118 = vmatpush.bf16.msrb.mxu2 %v3633_v14  ;;  %v4138_v14 = vld [vmem:[#allocation7 + $0x604] sm:$0xf]  ;;  %v3108_v62 = vld [vmem:[#allocation7 + $0x288] sm:$0xf]  ;;  %v4061_v3 = vld [vmem:[#allocation7 + $0x394] sm:$0xf0]  ;;  %v2965_v4 = vor.u32 %v3993_v59, %v2964_v58 }
  0xe6   :  { %2132 = vmatpush.bf16.msrb.mxu3 %v3761_v15  ;;  %v3550_v15 = vld [vmem:[#allocation7 + $0x610] sm:$0xf0]  ;;  %v3109_v7 = vor.u32 %v4029_v63, %v3108_v62  ;;  %v3989_v9 = vld [vmem:[#allocation7 + $0x154] sm:$0xf0]  ;;  %v3092_v12 = vld [vmem:[#allocation7 + $0x268] sm:$0xf] }
  0xe7   :  { %2092 = vmatpush.bf16.msrb.mxu0 %v3345_v19  ;;  %2106 = vmatpush.bf16.msrb.mxu1 %v3473_v20  ;;  %v3156_v19 = vld [vmem:[#allocation7 + $0x2e8] sm:$0xf]  ;;  %v4041_v20 = vld [vmem:[#allocation7 + $0x2f4] sm:$0xf0]  ;;  %v3553_v52 = vor.u32 %v4138_v14, %v3550_v15 }
  0xe8   :  { %v3157_v31 = vor.u32 %v4041_v20, %v3156_v19  ;;  %v3220_v15 = vld [vmem:[#allocation7 + $0x368] sm:$0xf]  ;;  %v3953_v20 = vld [vmem:[#allocation7 + $0x34] sm:$0xf0] }
  0xe9   :  { %2119 = vmatpush.bf16.msrb.mxu2 %v3617_v29  ;;  %v3969_v29 = vld [vmem:[#allocation7 + $0xb4] sm:$0xf0]  ;;  %v2804_v19 = vld [vmem:[#allocation7 + $0x28] sm:$0xf] }
  0xea   :  { %2133 = vmatpush.bf16.msrb.mxu3 %v3745_v30  ;;  %v3681_v30 = vor.u32 %v4170_v17, %v3678_v18  ;;  %v2869_v37 = vor.u32 %v3969_v29, %v2868_v28  ;;  %v4057_v17 = vld [vmem:[#allocation7 + $0x374] sm:$0xf0]  ;;  %v2805_v29 = vor.u32 %v3953_v20, %v2804_v19  ;;  %v2916_v35 = vld [vmem:[#allocation7 + $0x108] sm:$0xf] }
  0xeb   :  { %2093 = vmatpush.bf16.msrb.mxu0 %v3329_v32  ;;  %2107 = vmatpush.bf16.msrb.mxu1 %v3457_v34  ;;  %v4001_v32 = vld [vmem:[#allocation7 + $0x1b4] sm:$0xf0]  ;;  %v3285_v34 = vor.u32 %v4073_v25, %v3284_v23  ;;  %v3221_v25 = vor.u32 %v4057_v17, %v3220_v15  ;;  %v3044_v59 = vld [vmem:[#allocation7 + $0x208] sm:$0xf] }
  0xec   :  { %v2997_v40 = vor.u32 %v4001_v32, %v2996_v27  ;;  %v3985_v23 = vld [vmem:[#allocation7 + $0x134] sm:$0xf0]  ;;  %v2788_v27 = vld [vmem:[#allocation7 + $0x8] sm:$0xf] }
  0xed   :  { %2120 = vmatpush.bf16.msrb.mxu2 %v3601_v41  ;;  %v2852_v41 = vld [vmem:[#allocation7 + $0x88] sm:$0xf]  ;;  %v4021_v28 = vld [vmem:[#allocation7 + $0x254] sm:$0xf0] }
  0xee   :  { %2134 = vmatpush.bf16.msrb.mxu3 %v3729_v42  ;;  %v3965_v42 = vld [vmem:[#allocation7 + $0x94] sm:$0xf0]  ;;  %v3172_v62 = vld [vmem:[#allocation7 + $0x308] sm:$0xf] }
  0xef   :  { %2094 = vmatpush.bf16.msrb.mxu0 %v3313_v47  ;;  %2108 = vmatpush.bf16.msrb.mxu1 %v3441_v48  ;;  %v3269_v47 = vor.u32 %v4069_v39, %v3268_v38  ;;  %v3124_v48 = vld [vmem:[#allocation7 + $0x2a8] sm:$0xf]  ;;  %v2853_v51 = vor.u32 %v3965_v42, %v2852_v41  ;;  %v3981_v36 = vld [vmem:[#allocation7 + $0x114] sm:$0xf0] }
  0xf0   :  { %v3125_v57 = vor.u32 %v4033_v49, %v3124_v48  ;;  %v3412_v38 = vld [vmem:[#allocation7 + $0x4e8] sm:$0xf]  ;;  %v4105_v39 = vld [vmem:[#allocation7 + $0x4f4] sm:$0xf0]  ;;  %v2917_v49 = vor.u32 %v3981_v36, %v2916_v35 }
  0xf1   :  { %2121 = vmatpush.bf16.msrb.mxu2 %v3585_v26  ;;  %v3961_v26 = vld [vmem:[#allocation7 + $0x74] sm:$0xf0]  ;;  %v3652_v17 = vld [vmem:[#allocation7 + $0x6c8] sm:$0xf] }
  0xf2   :  { %2135 = vmatpush.bf16.msrb.mxu3 %v3713_v61  ;;  %v3253_v61 = vor.u32 %v4065_v54, %v3252_v53  ;;  %v4137_v42 = vld [vmem:[#allocation7 + $0x5f4] sm:$0xf0]  ;;  %v3396_v53 = vld [vmem:[#allocation7 + $0x4c8] sm:$0xf] }
  0xf3   :  { %2095 = vmatpush.bf16.msrb.mxu0 %v3297_v0  ;;  %2109 = vmatpush.bf16.msrb.mxu1 %v3425_v2  ;;  %v2837_v0 = vor.u32 %v3961_v26, %v2836_v56  ;;  %v3236_v2 = vld [vmem:[#allocation7 + $0x388] sm:$0xf]  ;;  %v4017_v45 = vld [vmem:[#allocation7 + $0x234] sm:$0xf0] }
  0xf4   :  { %v3237_v10 = vor.u32 %v4061_v3, %v3236_v2  ;;  %v4049_v48 = vld [vmem:[#allocation7 + $0x334] sm:$0xf0]  ;;  %v3524_v26 = vld [vmem:[#allocation7 + $0x5c8] sm:$0xf] }
  0xf5   :  { %2122 = vmatpush.bf16.msrb.mxu2 %v3569_v8  ;;  %v2948_v8 = vld [vmem:[#allocation7 + $0x148] sm:$0xf]  ;;  %v4101_v56 = vld [vmem:[#allocation7 + $0x4d4] sm:$0xf0] }
  0xf6   :  { %2136 = vmatpush.bf16.msrb.mxu3 %v3697_v13  ;;  %2096 = vmatmul.bf16.vlgmr.msrb.gmra.mxu0 %v4513_v24  ;;  %v4025_v13 = vld [vmem:[#allocation7 + $0x274] sm:$0xf0]  ;;  %v2949_v18 = vor.u32 %v3989_v9, %v2948_v8  ;;  %v3397_v3 = vor.u32 %v4101_v56, %v3396_v53  ;;  %v3380_v8 = vld [vmem:[#allocation7 + $0x4a8] sm:$0xf] }
  0xf7   :  { %2144 = vmatpush.bf16.msra.mxu0 %v2901_v5  ;;  %2158 = vmatpush.bf16.msra.mxu1 %v3029_v6  ;;  %v2820_v5 = vld [vmem:[#allocation7 + $0x48] sm:$0xf]  ;;  %v3957_v6 = vld [vmem:[#allocation7 + $0x54] sm:$0xf0] }
  0xf8   :  { %2110 = vmatmul.bf16.vlgmr.msrb.gmra.mxu1 %v4515_v33  ;;  %v2821_v14 = vor.u32 %v3957_v6, %v2820_v5  ;;  %v4045_v63 = vld [vmem:[#allocation7 + $0x314] sm:$0xf0]  ;;  %v3780_v20 = vld [vmem:[#allocation7 + $0x7c8] sm:$0xf] }
  0xf9   :  { %2123 = vmatpush.bf16.msrb.mxu2 %v3553_v52  ;;  %v3076_v52 = vld [vmem:[#allocation7 + $0x248] sm:$0xf]  ;;  %v4169_v2 = vld [vmem:[#allocation7 + $0x6f4] sm:$0xf0] }
  0xfa   :  { %2137 = vmatpush.bf16.msrb.mxu3 %v3681_v30  ;;  %v3204_v30 = vld [vmem:[#allocation7 + $0x348] sm:$0xf]  ;;  %v4201_v5 = vld [vmem:[#allocation7 + $0x7f4] sm:$0xf0] }
  0xfb   :  { %2145 = vmatpush.bf16.msra.mxu0 %v2885_v21  ;;  %2159 = vmatpush.bf16.msra.mxu1 %v3013_v22  ;;  %v3093_v21 = vor.u32 %v4025_v13, %v3092_v12  ;;  %v2932_v22 = vld [vmem:[#allocation7 + $0x128] sm:$0xf]  ;;  %v4097_v9 = vld [vmem:[#allocation7 + $0x4b4] sm:$0xf0] }
  0xfc   :  { %2124 = vmatmul.bf16.vlgmr.msrb.gmra.mxu2 %v4519_v60  ;;  %v2933_v32 = vor.u32 %v3985_v23, %v2932_v22  ;;  %v3508_v13 = vld [vmem:[#allocation7 + $0x5a8] sm:$0xf]  ;;  %v3381_v19 = vor.u32 %v4097_v9, %v3380_v8  ;;  %v4193_v35 = vld [vmem:[#allocation7 + $0x7b4] sm:$0xf0] }
  0xfd   :  { %2172 = vmatpush.bf16.msra.mxu2 %v3157_v31  ;;  %2138 = vmatmul.bf16.vlgmr.msrb.gmra.mxu3 %v4521_v1  ;;  %v4053_v31 = vld [vmem:[#allocation7 + $0x354] sm:$0xf0]  ;;  %v3364_v23 = vld [vmem:[#allocation7 + $0x488] sm:$0xf] }
  0xfe   :  { %2186 = vmatpush.bf16.msra.mxu3 %v3285_v34  ;;  %v3949_v34 = vld [vmem:[#allocation7 + $0x14] sm:$0xf0]  ;;  %v3205_v41 = vor.u32 %v4053_v31, %v3204_v30  ;;  %v3636_v31 = vld [vmem:[#allocation7 + $0x6a8] sm:$0xf] }
  0xff   :  { %2146 = vmatpush.bf16.msra.mxu0 %v2869_v37  ;;  %2160 = vmatpush.bf16.msra.mxu1 %v2997_v40  ;;  %v3077_v37 = vor.u32 %v4021_v28, %v3076_v52  ;;  %v3540_v40 = vld [vmem:[#allocation7 + $0x5e8] sm:$0xf]  ;;  %v2789_v46 = vor.u32 %v3949_v34, %v2788_v27  ;;  %v4161_v27 = vld [vmem:[#allocation7 + $0x6b4] sm:$0xf0] }
 0x100   :  { %v3541_v54 = vor.u32 %v4137_v42, %v3540_v40  ;;  %v3492_v28 = vld [vmem:[#allocation7 + $0x588] sm:$0xf]  ;;  %v4085_v53 = vld [vmem:[#allocation7 + $0x454] sm:$0xf0] }
 0x101   :  { %2173 = vmatpush.bf16.msra.mxu2 %v3141_v43  ;;  %v3060_v43 = vld [vmem:[#allocation7 + $0x228] sm:$0xf]  ;;  %v4117_v56 = vld [vmem:[#allocation7 + $0x554] sm:$0xf0] }
 0x102   :  { %2187 = vmatpush.bf16.msra.mxu3 %v3269_v47  ;;  %v3188_v47 = vld [vmem:[#allocation7 + $0x328] sm:$0xf]  ;;  %v4149_v8 = vld [vmem:[#allocation7 + $0x654] sm:$0xf0] }
 0x103   :  { %2147 = vmatpush.bf16.msra.mxu0 %v2853_v51  ;;  %2161 = vmatpush.bf16.msra.mxu1 %v2981_v55  ;;  %v3413_v51 = vor.u32 %v4105_v39, %v3412_v38  ;;  %v3061_v55 = vor.u32 %v4017_v45, %v3060_v43  ;;  %v3189_v58 = vor.u32 %v4049_v48, %v3188_v47  ;;  %v3764_v34 = vld [vmem:[#allocation7 + $0x7a8] sm:$0xf]  ;;  %v4089_v38 = vld [vmem:[#allocation7 + $0x474] sm:$0xf0] }
 0x104   :  { %v3637_v39 = vor.u32 %v4161_v27, %v3636_v31  ;;  %v3476_v40 = vld [vmem:[#allocation7 + $0x568] sm:$0xf]  ;;  %v3765_v42 = vor.u32 %v4193_v35, %v3764_v34  ;;  %v4157_v45 = vld [vmem:[#allocation7 + $0x694] sm:$0xf0]  ;;  %v3971_v34 = vld [vmem:[#allocation7 + $0xcc] sm:$0xf] }
 0x105   :  { %2174 = vmatpush.bf16.msra.mxu2 %v3125_v57  ;;  %v4133_v57 = vld [vmem:[#allocation7 + $0x5d4] sm:$0xf0]  ;;  %v3620_v43 = vld [vmem:[#allocation7 + $0x688] sm:$0xf] }
 0x106   :  { %2188 = vmatpush.bf16.msra.mxu3 %v3253_v61  ;;  %v4013_v61 = vld [vmem:[#allocation7 + $0x214] sm:$0xf0]  ;;  %v3525_v6 = vor.u32 %v4133_v57, %v3524_v26  ;;  %v3748_v47 = vld [vmem:[#allocation7 + $0x788] sm:$0xf] }
 0x107   :  { %2148 = vmatpush.bf16.msra.mxu0 %v2837_v0  ;;  %2162 = vmatpush.bf16.msra.mxu1 %v2965_v4  ;;  %v3668_v0 = vld [vmem:[#allocation7 + $0x6e8] sm:$0xf]  ;;  %v4189_v48 = vld [vmem:[#allocation7 + $0x794] sm:$0xf0] }
 0x108   :  { %v3796_v4 = vld [vmem:[#allocation7 + $0x7e8] sm:$0xf]  ;;  %v3669_v12 = vor.u32 %v4169_v2, %v3668_v0  ;;  %v3749_v26 = vor.u32 %v4189_v48, %v3748_v47  ;;  %v4081_v2 = vld [vmem:[#allocation7 + $0x434] sm:$0xf0]  ;;  %v3158_v47 = vld [vmem:[#allocation7 + $0x2f8] sm:$0xf0] }
 0x109   :  { %2175 = vmatpush.bf16.msra.mxu2 %v3109_v7  ;;  %v3045_v7 = vor.u32 %v4013_v61, %v3044_v59  ;;  %v3797_v15 = vor.u32 %v4201_v5, %v3796_v4  ;;  %v3604_v57 = vld [vmem:[#allocation7 + $0x668] sm:$0xf]  ;;  %v4113_v5 = vld [vmem:[#allocation7 + $0x534] sm:$0xf0] }
 0x10a   :  { %2189 = vmatpush.bf16.msra.mxu3 %v3237_v10  ;;  %v3173_v10 = vor.u32 %v4045_v63, %v3172_v62  ;;  %v3732_v61 = vld [vmem:[#allocation7 + $0x768] sm:$0xf]  ;;  %v4185_v62 = vld [vmem:[#allocation7 + $0x774] sm:$0xf0] }
 0x10b   :  { %2149 = vmatpush.bf16.msra.mxu0 %v2821_v14  ;;  %2163 = vmatpush.bf16.msra.mxu1 %v2949_v18  ;;  %v4129_v14 = vld [vmem:[#allocation7 + $0x5b4] sm:$0xf0]  ;;  %v3316_v0 = vld [vmem:[#allocation7 + $0x428] sm:$0xf] }
 0x10c   :  { %v4165_v18 = vld [vmem:[#allocation7 + $0x6d4] sm:$0xf0]  ;;  %v3509_v22 = vor.u32 %v4129_v14, %v3508_v13  ;;  %v3444_v4 = vld [vmem:[#allocation7 + $0x528] sm:$0xf]  ;;  %v3317_v9 = vor.u32 %v4081_v2, %v3316_v0  ;;  %v4067_v2 = vld [vmem:[#allocation7 + $0x3cc] sm:$0xf] }
 0x10d   :  { %2176 = vmatpush.bf16.msra.mxu2 %v3093_v21  ;;  %v4197_v21 = vld [vmem:[#allocation7 + $0x7d4] sm:$0xf0]  ;;  %v3653_v52 = vor.u32 %v4165_v18, %v3652_v17  ;;  %v3300_v13 = vld [vmem:[#allocation7 + $0x408] sm:$0xf]  ;;  %v3445_v14 = vor.u32 %v4113_v5, %v3444_v4  ;;  %v3963_v5 = vld [vmem:[#allocation7 + $0x8c] sm:$0xf] }
 0x10e   :  { %2190 = vmatpush.bf16.msra.mxu3 %v3221_v25  ;;  %v4093_v25 = vld [vmem:[#allocation7 + $0x494] sm:$0xf0]  ;;  %v3781_v30 = vor.u32 %v4197_v21, %v3780_v20  ;;  %v3428_v17 = vld [vmem:[#allocation7 + $0x508] sm:$0xf]  ;;  %v3975_v20 = vld [vmem:[#allocation7 + $0xec] sm:$0xf] }
 0x10f   :  { %2150 = vmatpush.bf16.msra.mxu0 %v2805_v29  ;;  %2164 = vmatpush.bf16.msra.mxu1 %v2933_v32  ;;  %v4125_v29 = vld [vmem:[#allocation7 + $0x594] sm:$0xf0]  ;;  %v3365_v32 = vor.u32 %v4093_v25, %v3364_v23  ;;  %v2902_v21 = vld [vmem:[#allocation7 + $0xf8] sm:$0xf0] }
 0x110   :  { %v3493_v36 = vor.u32 %v4125_v29, %v3492_v28  ;;  %v4109_v18 = vld [vmem:[#allocation7 + $0x514] sm:$0xf0]  ;;  %v3030_v25 = vld [vmem:[#allocation7 + $0x1f8] sm:$0xf0] }
 0x111   :  { %2177 = vmatpush.bf16.msra.mxu2 %v3077_v37  ;;  %v3348_v37 = vld [vmem:[#allocation7 + $0x468] sm:$0xf]  ;;  %v4145_v28 = vld [vmem:[#allocation7 + $0x634] sm:$0xf0]  ;;  %v3429_v27 = vor.u32 %v4109_v18, %v3428_v17  ;;  %v3254_v17 = vld [vmem:[#allocation7 + $0x3b8] sm:$0xf0] }
 0x112   :  { %2191 = vmatpush.bf16.msra.mxu3 %v3205_v41  ;;  %v4121_v41 = vld [vmem:[#allocation7 + $0x574] sm:$0xf0] }
 0x113   :  { %2151 = vmatpush.bf16.msra.mxu0 %v2789_v46  ;;  %2165 = vmatpush.bf16.msra.mxu1 %v2917_v49  ;;  %v3349_v46 = vor.u32 %v4089_v38, %v3348_v37  ;;  %v3477_v49 = vor.u32 %v4121_v41, %v3476_v40  ;;  %v4177_v31 = vld [vmem:[#allocation7 + $0x734] sm:$0xf0]  ;;  %v2886_v37 = vld [vmem:[#allocation7 + $0xd8] sm:$0xf0]  ;;  %v4003_v38 = vld [vmem:[#allocation7 + $0x1cc] sm:$0xf] }
 0x114   :  { %v3556_v41 = vld [vmem:[#allocation7 + $0x608] sm:$0xf]  ;;  %v2889_v48 = vor.u32 %v3971_v34, %v2886_v37  ;;  %v3955_v34 = vld [vmem:[#allocation7 + $0x4c] sm:$0xf] }
 0x115   :  { %2178 = vmatpush.bf16.msra.mxu2 %v3061_v55  ;;  %v3460_v55 = vld [vmem:[#allocation7 + $0x548] sm:$0xf]  ;;  %v3987_v37 = vld [vmem:[#allocation7 + $0x14c] sm:$0xf] }
 0x116   :  { %2192 = vmatpush.bf16.msra.mxu3 %v3189_v58  ;;  %2152 = vmatmul.bf16.vlgmr.msra.gmra.mxu0 %v4497_v11  ;;  %v4153_v58 = vld [vmem:[#allocation7 + $0x674] sm:$0xf0]  ;;  %v3461_v63 = vor.u32 %v4117_v56, %v3460_v55  ;;  %v3967_v55 = vld [vmem:[#allocation7 + $0xac] sm:$0xf]  ;;  %v2870_v56 = vld [vmem:[#allocation7 + $0xb8] sm:$0xf0] }
 0x117   :  { %2200 = vmatpush.bf16.msrb.mxu0 %v3413_v51  ;;  %2214 = vmatpush.bf16.msrb.mxu1 %v3541_v54  ;;  %v3332_v51 = vld [vmem:[#allocation7 + $0x448] sm:$0xf]  ;;  %v3621_v54 = vor.u32 %v4157_v45, %v3620_v43  ;;  %v4173_v45 = vld [vmem:[#allocation7 + $0x714] sm:$0xf0]  ;;  %v2873_v0 = vor.u32 %v3967_v55, %v2870_v56  ;;  %v4019_v56 = vld [vmem:[#allocation7 + $0x24c] sm:$0xf] }
 0x118   :  { %2166 = vmatmul.bf16.vlgmr.msra.gmra.mxu1 %v4499_v16  ;;  %v3333_v59 = vor.u32 %v4085_v53, %v3332_v51  ;;  %v3684_v43 = vld [vmem:[#allocation7 + $0x708] sm:$0xf]  ;;  %v3286_v51 = vld [vmem:[#allocation7 + $0x3f8] sm:$0xf0] }
 0x119   :  { %2179 = vmatpush.bf16.msra.mxu2 %v3045_v7  ;;  %v3588_v7 = vld [vmem:[#allocation7 + $0x648] sm:$0xf] }
 0x11a   :  { %2193 = vmatpush.bf16.msra.mxu3 %v3173_v10  ;;  %v3716_v10 = vld [vmem:[#allocation7 + $0x748] sm:$0xf] }
 0x11b   :  { %2201 = vmatpush.bf16.msrb.mxu0 %v3397_v3  ;;  %2215 = vmatpush.bf16.msrb.mxu1 %v3525_v6  ;;  %v3605_v3 = vor.u32 %v4153_v58, %v3604_v57  ;;  %v3733_v6 = vor.u32 %v4185_v62, %v3732_v61  ;;  %v3999_v58 = vld [vmem:[#allocation7 + $0x1ac] sm:$0xf] }
 0x11c   :  { %2180 = vmatmul.bf16.vlgmr.msra.gmra.mxu2 %v4505_v44  ;;  %v4035_v62 = vld [vmem:[#allocation7 + $0x2cc] sm:$0xf] }
 0x11d   :  { %2228 = vmatpush.bf16.msrb.mxu2 %v3669_v12  ;;  %2194 = vmatmul.bf16.vlgmr.msra.gmra.mxu3 %v4507_v50  ;;  %v4181_v12 = vld [vmem:[#allocation7 + $0x754] sm:$0xf0] }
 0x11e   :  { %2242 = vmatpush.bf16.msrb.mxu3 %v3797_v15  ;;  %v4077_v15 = vld [vmem:[#allocation7 + $0x414] sm:$0xf0]  ;;  %v3717_v23 = vor.u32 %v4181_v12, %v3716_v10  ;;  %v4031_v12 = vld [vmem:[#allocation7 + $0x2ac] sm:$0xf] }
 0x11f   :  { %2202 = vmatpush.bf16.msrb.mxu0 %v3381_v19  ;;  %2216 = vmatpush.bf16.msrb.mxu1 %v3509_v22  ;;  %v3589_v19 = vor.u32 %v4149_v8, %v3588_v7  ;;  %v4007_v22 = vld [vmem:[#allocation7 + $0x1ec] sm:$0xf]  ;;  %v3301_v29 = vor.u32 %v4077_v15, %v3300_v13  ;;  %v3126_v13 = vld [vmem:[#allocation7 + $0x2b8] sm:$0xf0] }
 0x120   :  { %v3033_v35 = vor.u32 %v4007_v22, %v3030_v25  ;;  %v3995_v8 = vld [vmem:[#allocation7 + $0x18c] sm:$0xf] }
 0x121   :  { %2229 = vmatpush.bf16.msrb.mxu2 %v3653_v52  ;;  %v3572_v52 = vld [vmem:[#allocation7 + $0x628] sm:$0xf]  ;;  %v4063_v15 = vld [vmem:[#allocation7 + $0x3ac] sm:$0xf] }
 0x122   :  { %2243 = vmatpush.bf16.msrb.mxu3 %v3781_v30  ;;  %v3700_v30 = vld [vmem:[#allocation7 + $0x728] sm:$0xf]  ;;  %v3991_v22 = vld [vmem:[#allocation7 + $0x16c] sm:$0xf]  ;;  %v3257_v25 = vor.u32 %v4063_v15, %v3254_v17 }
 0x123   :  { %2203 = vmatpush.bf16.msrb.mxu0 %v3365_v32  ;;  %2217 = vmatpush.bf16.msrb.mxu1 %v3493_v36  ;;  %v2905_v32 = vor.u32 %v3975_v20, %v2902_v21  ;;  %v3573_v36 = vor.u32 %v4145_v28, %v3572_v52  ;;  %v3701_v40 = vor.u32 %v4177_v31, %v3700_v30  ;;  %v2838_v20 = vld [vmem:[#allocation7 + $0x78] sm:$0xf0]  ;;  %v4027_v52 = vld [vmem:[#allocation7 + $0x28c] sm:$0xf] }
 0x124   :  { %v3129_v21 = vor.u32 %v4031_v12, %v3126_v13  ;;  %v3110_v28 = vld [vmem:[#allocation7 + $0x298] sm:$0xf0]  ;;  %v4059_v30 = vld [vmem:[#allocation7 + $0x38c] sm:$0xf] }
 0x125   :  { %2230 = vmatpush.bf16.msrb.mxu2 %v3637_v39  ;;  %v3014_v39 = vld [vmem:[#allocation7 + $0x1d8] sm:$0xf0]  ;;  %v4015_v12 = vld [vmem:[#allocation7 + $0x22c] sm:$0xf] }
 0x126   :  { %2244 = vmatpush.bf16.msrb.mxu3 %v3765_v42  ;;  %v4141_v42 = vld [vmem:[#allocation7 + $0x614] sm:$0xf0]  ;;  %v3017_v53 = vor.u32 %v4003_v38, %v3014_v39  ;;  %v3238_v31 = vld [vmem:[#allocation7 + $0x398] sm:$0xf0]  ;;  %v4047_v17 = vld [vmem:[#allocation7 + $0x32c] sm:$0xf] }
 0x127   :  { %2204 = vmatpush.bf16.msrb.mxu0 %v3349_v46  ;;  %2218 = vmatpush.bf16.msrb.mxu1 %v3477_v49  ;;  %v4039_v46 = vld [vmem:[#allocation7 + $0x2ec] sm:$0xf]  ;;  %v2950_v38 = vld [vmem:[#allocation7 + $0x158] sm:$0xf0]  ;;  %v3241_v39 = vor.u32 %v4059_v30, %v3238_v31 }
 0x128   :  { %v4071_v49 = vld [vmem:[#allocation7 + $0x3ec] sm:$0xf]  ;;  %v3161_v57 = vor.u32 %v4039_v46, %v3158_v47  ;;  %v2953_v46 = vor.u32 %v3987_v37, %v2950_v38  ;;  %v3062_v13 = vld [vmem:[#allocation7 + $0x238] sm:$0xf0] }
 0x129   :  { %2231 = vmatpush.bf16.msrb.mxu2 %v3621_v54  ;;  %v3557_v54 = vor.u32 %v4141_v42, %v3556_v41  ;;  %v3289_v61 = vor.u32 %v4071_v49, %v3286_v51  ;;  %v3094_v41 = vld [vmem:[#allocation7 + $0x278] sm:$0xf0]  ;;  %v3951_v47 = vld [vmem:[#allocation7 + $0x2c] sm:$0xf] }
 0x12a   :  { %2245 = vmatpush.bf16.msrb.mxu3 %v3749_v26  ;;  %v3685_v26 = vor.u32 %v4173_v45, %v3684_v43  ;;  %v4055_v43 = vld [vmem:[#allocation7 + $0x36c] sm:$0xf]  ;;  %v3222_v45 = vld [vmem:[#allocation7 + $0x378] sm:$0xf0] }
 0x12b   :  { %2205 = vmatpush.bf16.msrb.mxu0 %v3333_v59  ;;  %2219 = vmatpush.bf16.msrb.mxu1 %v3461_v63  ;;  %v2998_v59 = vld [vmem:[#allocation7 + $0x1b8] sm:$0xf0]  ;;  %v3983_v51 = vld [vmem:[#allocation7 + $0x12c] sm:$0xf]  ;;  %v3225_v55 = vor.u32 %v4055_v43, %v3222_v45 }
 0x12c   :  { %v3142_v63 = vld [vmem:[#allocation7 + $0x2d8] sm:$0xf0]  ;;  %v3001_v4 = vor.u32 %v3999_v58, %v2998_v59  ;;  %v4051_v58 = vld [vmem:[#allocation7 + $0x34c] sm:$0xf] }
 0x12d   :  { %2232 = vmatpush.bf16.msrb.mxu2 %v3605_v3  ;;  %v3270_v3 = vld [vmem:[#allocation7 + $0x3d8] sm:$0xf0]  ;;  %v3145_v7 = vor.u32 %v4035_v62, %v3142_v63  ;;  %v4011_v30 = vld [vmem:[#allocation7 + $0x20c] sm:$0xf] }
 0x12e   :  { %2246 = vmatpush.bf16.msrb.mxu3 %v3733_v6  ;;  %v2854_v6 = vld [vmem:[#allocation7 + $0x98] sm:$0xf0]  ;;  %v3273_v10 = vor.u32 %v4067_v2, %v3270_v3  ;;  %v4095_v43 = vld [vmem:[#allocation7 + $0x4ac] sm:$0xf] }
 0x12f   :  { %2206 = vmatpush.bf16.msrb.mxu0 %v3317_v9  ;;  %2220 = vmatpush.bf16.msrb.mxu1 %v3445_v14  ;;  %v2982_v9 = vld [vmem:[#allocation7 + $0x198] sm:$0xf0]  ;;  %v2857_v14 = vor.u32 %v3963_v5, %v2854_v6  ;;  %v4135_v6 = vld [vmem:[#allocation7 + $0x5ec] sm:$0xf] }
 0x130   :  { %v2985_v18 = vor.u32 %v3995_v8, %v2982_v9  ;;  %v3206_v59 = vld [vmem:[#allocation7 + $0x358] sm:$0xf0] }
 0x131   :  { %2233 = vmatpush.bf16.msrb.mxu2 %v3589_v19  ;;  %v3959_v19 = vld [vmem:[#allocation7 + $0x6c] sm:$0xf]  ;;  %v2790_v63 = vld [vmem:[#allocation7 + $0x18] sm:$0xf0]  ;;  %v3209_v9 = vor.u32 %v4051_v58, %v3206_v59 }
 0x132   :  { %2247 = vmatpush.bf16.msrb.mxu3 %v3717_v23  ;;  %v2966_v23 = vld [vmem:[#allocation7 + $0x178] sm:$0xf0]  ;;  %v4195_v58 = vld [vmem:[#allocation7 + $0x7cc] sm:$0xf] }
 0x133   :  { %2207 = vmatpush.bf16.msrb.mxu0 %v3301_v29  ;;  %2221 = vmatpush.bf16.msrb.mxu1 %v3429_v27  ;;  %v2841_v29 = vor.u32 %v3959_v19, %v2838_v20  ;;  %v4541_v27 = vpop.f32.mrf.mxu0  ;;  %v2918_v2 = vld [vmem:[#allocation7 + $0x118] sm:$0xf0] }
 0x134   :  { %v3414_v5 = vld [vmem:[#allocation7 + $0x4f8] sm:$0xf0] }
 0x135   :  { %2234 = vmatpush.bf16.msrb.mxu2 %v3573_v36  ;;  %v3113_v36 = vor.u32 %v4027_v52, %v3110_v28  ;;  %v4131_v52 = vld [vmem:[#allocation7 + $0x5cc] sm:$0xf]  ;;  %v3526_v28 = vld [vmem:[#allocation7 + $0x5d8] sm:$0xf0] }
 0x136   :  { %2248 = vmatpush.bf16.msrb.mxu3 %v3701_v40  ;;  %2208 = vmatmul.bf16.vlgmr.msrb.gmra.mxu0 %v4513_v24  ;;  %v4023_v40 = vld [vmem:[#allocation7 + $0x26c] sm:$0xf]  ;;  %v3046_v31 = vld [vmem:[#allocation7 + $0x218] sm:$0xf0] }
 0x137   :  { %2256 = vmatpush.bf16.msra.mxu0 %v2905_v32  ;;  %2270 = vmatpush.bf16.msra.mxu1 %v3033_v35  ;;  %v2969_v32 = vor.u32 %v3991_v22, %v2966_v23  ;;  %v2822_v35 = vld [vmem:[#allocation7 + $0x58] sm:$0xf0]  ;;  %v3097_v49 = vor.u32 %v4023_v40, %v3094_v41  ;;  %v3065_v23 = vor.u32 %v4015_v12, %v3062_v13  ;;  %v4087_v13 = vld [vmem:[#allocation7 + $0x46c] sm:$0xf] }
 0x138   :  { %2222 = vmatmul.bf16.vlgmr.msrb.gmra.mxu1 %v4515_v33  ;;  %v2825_v42 = vor.u32 %v3955_v34, %v2822_v35  ;;  %v3174_v34 = vld [vmem:[#allocation7 + $0x318] sm:$0xf0]  ;;  %v4167_v35 = vld [vmem:[#allocation7 + $0x6ec] sm:$0xf]  ;;  %v3529_v41 = vor.u32 %v4131_v52, %v3526_v28 }
 0x139   :  { %2235 = vmatpush.bf16.msrb.mxu2 %v3557_v54  ;;  %v4543_v54 = vpop.f32.mrf.mxu1  ;;  %v3798_v40 = vld [vmem:[#allocation7 + $0x7f8] sm:$0xf0]  ;;  %v4083_v28 = vld [vmem:[#allocation7 + $0x44c] sm:$0xf] }
 0x13a   :  { %2249 = vmatpush.bf16.msrb.mxu3 %v3685_v26  ;;  %v3078_v26 = vld [vmem:[#allocation7 + $0x258] sm:$0xf0] }
 0x13b   :  { %2257 = vmatpush.bf16.msra.mxu0 %v2889_v48  ;;  %2271 = vmatpush.bf16.msra.mxu1 %v3017_v53  ;;  %v2806_v48 = vld [vmem:[#allocation7 + $0x38] sm:$0xf0]  ;;  %v3081_v3 = vor.u32 %v4019_v56, %v3078_v26 }
 0x13c   :  { %2236 = vmatmul.bf16.vlgmr.msrb.gmra.mxu2 %v4519_v60  ;;  %v2934_v53 = vld [vmem:[#allocation7 + $0x138] sm:$0xf0] }
 0x13d   :  { %2284 = vmatpush.bf16.msra.mxu2 %v3161_v57  ;;  %2250 = vmatmul.bf16.vlgmr.msrb.gmra.mxu3 %v4521_v1  ;;  %v2809_v57 = vor.u32 %v3951_v47, %v2806_v48  ;;  %v2937_v62 = vor.u32 %v3983_v51, %v2934_v53  ;;  %v3382_v45 = vld [vmem:[#allocation7 + $0x4b8] sm:$0xf0]  ;;  %v4127_v48 = vld [vmem:[#allocation7 + $0x5ac] sm:$0xf] }
 0x13e   :  { %2298 = vmatpush.bf16.msra.mxu3 %v3289_v61  ;;  %v3947_v61 = vld [vmem:[#allocation7 + $0xc] sm:$0xf]  ;;  %v3782_v59 = vld [vmem:[#allocation7 + $0x7d8] sm:$0xf0] }
 0x13f   :  { %2258 = vmatpush.bf16.msra.mxu0 %v2873_v0  ;;  %2272 = vmatpush.bf16.msra.mxu1 %v3001_v4  ;;  %v3979_v0 = vld [vmem:[#allocation7 + $0x10c] sm:$0xf]  ;;  %v4547_v8 = vpop.f32.mrf.mxu2  ;;  %v2793_v15 = vor.u32 %v3947_v61, %v2790_v63  ;;  %v3366_v63 = vld [vmem:[#allocation7 + $0x498] sm:$0xf0] }
 0x140   :  { %v4103_v4 = vld [vmem:[#allocation7 + $0x4ec] sm:$0xf]  ;;  %v2921_v19 = vor.u32 %v3979_v0, %v2918_v2  ;;  %v3494_v2 = vld [vmem:[#allocation7 + $0x598] sm:$0xf0] }
 0x141   :  { %2285 = vmatpush.bf16.msra.mxu2 %v3145_v7  ;;  %v4545_v7 = vpop.f32.mrf.mxu0  ;;  %v3417_v20 = vor.u32 %v4103_v4, %v3414_v5  ;;  %v4551_v37 = vpop.f32.mrf.mxu1  ;;  %v4163_v53 = vld [vmem:[#allocation7 + $0x6cc] sm:$0xf]  ;;  %v3638_v5 = vld [vmem:[#allocation7 + $0x6b8] sm:$0xf0] }
 0x142   :  { %2299 = vmatpush.bf16.msra.mxu3 %v3273_v10  ;;  %v3542_v10 = vld [vmem:[#allocation7 + $0x5f8] sm:$0xf0]  ;;  %v4123_v0 = vld [vmem:[#allocation7 + $0x58c] sm:$0xf] }
 0x143   :  { %2259 = vmatpush.bf16.msra.mxu0 %v2857_v14  ;;  %2273 = vmatpush.bf16.msra.mxu1 %v2985_v18  ;;  %v4549_v14 = vpop.f32.mrf.mxu3  ;;  %v3190_v18 = vld [vmem:[#allocation7 + $0x338] sm:$0xf0]  ;;  %v3545_v22 = vor.u32 %v4135_v6, %v3542_v10  ;;  %v4159_v4 = vld [vmem:[#allocation7 + $0x6ac] sm:$0xf]  ;;  %v3497_v12 = vor.u32 %v4123_v0, %v3494_v2 }
 0x144   :  { %v3766_v10 = vld [vmem:[#allocation7 + $0x7b8] sm:$0xf0]  ;;  %v4075_v0 = vld [vmem:[#allocation7 + $0x40c] sm:$0xf] }
 0x145   :  { %2286 = vmatpush.bf16.msra.mxu2 %v3129_v21  ;;  %v4099_v21 = vld [vmem:[#allocation7 + $0x4cc] sm:$0xf]  ;;  %v3750_v52 = vld [vmem:[#allocation7 + $0x798] sm:$0xf0] }
 0x146   :  { %2300 = vmatpush.bf16.msra.mxu3 %v3257_v25  ;;  %v3398_v25 = vld [vmem:[#allocation7 + $0x4d8] sm:$0xf0] }
 0x147   :  { %2260 = vmatpush.bf16.msra.mxu0 %v2841_v29  ;;  %2274 = vmatpush.bf16.msra.mxu1 %v2969_v32  ;;  %v3193_v29 = vor.u32 %v4047_v17, %v3190_v18  ;;  %v4043_v32 = vld [vmem:[#allocation7 + $0x30c] sm:$0xf]  ;;  %v3401_v38 = vor.u32 %v4099_v21, %v3398_v25  ;;  %v4557_v26 = vpop.f32.mrf.mxu2  ;;  %v3641_v18 = vor.u32 %v4159_v4, %v3638_v5  ;;  %v3302_v2 = vld [vmem:[#allocation7 + $0x418] sm:$0xf0] }
 0x148   :  { %v4187_v25 = vld [vmem:[#allocation7 + $0x78c] sm:$0xf]  ;;  %v3430_v5 = vld [vmem:[#allocation7 + $0x518] sm:$0xf0] }
 0x149   :  { %2287 = vmatpush.bf16.msra.mxu2 %v3113_v36  ;;  %v3670_v36 = vld [vmem:[#allocation7 + $0x6f8] sm:$0xf0]  ;;  %v4555_v56 = vpop.f32.mrf.mxu0  ;;  %v4563_v17 = vpop.f32.mrf.mxu1  ;;  %v4107_v4 = vld [vmem:[#allocation7 + $0x50c] sm:$0xf] }
 0x14a   :  { %2301 = vmatpush.bf16.msra.mxu3 %v3241_v39  ;;  %v4199_v39 = vld [vmem:[#allocation7 + $0x7ec] sm:$0xf]  ;;  %v3673_v47 = vor.u32 %v4167_v35, %v3670_v36  ;;  %v3462_v35 = vld [vmem:[#allocation7 + $0x558] sm:$0xf0] }
 0x14b   :  { %2261 = vmatpush.bf16.msra.mxu0 %v2825_v42  ;;  %2275 = vmatpush.bf16.msra.mxu1 %v2953_v46  ;;  %v3049_v42 = vor.u32 %v4011_v30, %v3046_v31  ;;  %v3177_v46 = vor.u32 %v4043_v32, %v3174_v34  ;;  %v3801_v51 = vor.u32 %v4199_v39, %v3798_v40  ;;  %v4559_v61 = vpop.f32.mrf.mxu3  ;;  %v4115_v34 = vld [vmem:[#allocation7 + $0x54c] sm:$0xf]  ;;  %v3606_v40 = vld [vmem:[#allocation7 + $0x678] sm:$0xf0] }
 0x14c   :  { %v4151_v39 = vld [vmem:[#allocation7 + $0x66c] sm:$0xf] }
 0x14d   :  { %2288 = vmatpush.bf16.msra.mxu2 %v3097_v49  ;;  %v3510_v49 = vld [vmem:[#allocation7 + $0x5b8] sm:$0xf0] }
 0x14e   :  { %2302 = vmatpush.bf16.msra.mxu3 %v3225_v55  ;;  %v3654_v55 = vld [vmem:[#allocation7 + $0x6d8] sm:$0xf0] }
 0x14f   :  { %2262 = vmatpush.bf16.msra.mxu0 %v2809_v57  ;;  %2276 = vmatpush.bf16.msra.mxu1 %v2937_v62  ;;  %v3385_v57 = vor.u32 %v4095_v43, %v3382_v45  ;;  %v4091_v62 = vld [vmem:[#allocation7 + $0x48c] sm:$0xf]  ;;  %v4567_v31 = vpop.f32.mrf.mxu2  ;;  %v3734_v43 = vld [vmem:[#allocation7 + $0x778] sm:$0xf0]  ;;  %v3465_v45 = vor.u32 %v4115_v34, %v3462_v35 }
 0x150   :  { %v3369_v6 = vor.u32 %v4091_v62, %v3366_v63  ;;  %v3718_v62 = vld [vmem:[#allocation7 + $0x758] sm:$0xf0]  ;;  %v4573_v63 = vld [vmem:[#allocation9] sm:$0xf]  ;;  %v4171_v34 = vld [vmem:[#allocation7 + $0x70c] sm:$0xf] }
 0x151   :  { %2289 = vmatpush.bf16.msra.mxu2 %v3081_v3  ;;  %v3785_v3 = vor.u32 %v4195_v58, %v3782_v59  ;;  %v4565_v30 = vpop.f32.mrf.mxu0  ;;  %v4571_v58 = vpop.f32.mrf.mxu1  ;;  %v3686_v35 = vld [vmem:[#allocation7 + $0x718] sm:$0xf0] }
 0x152   :  { %2303 = vmatpush.bf16.msra.mxu3 %v3209_v9  ;;  %v4191_v9 = vld [vmem:[#allocation7 + $0x7ac] sm:$0xf] }
 0x153   :  { %2263 = vmatpush.bf16.msra.mxu0 %v2793_v15  ;;  %2277 = vmatpush.bf16.msra.mxu1 %v2921_v19  ;;  %v3350_v15 = vld [vmem:[#allocation7 + $0x478] sm:$0xf0]  ;;  %v4119_v19 = vld [vmem:[#allocation7 + $0x56c] sm:$0xf]  ;;  %v3769_v21 = vor.u32 %v4191_v9, %v3766_v10  ;;  %v4569_v36 = vpop.f32.mrf.mxu3 }
 0x154   :  { %v4143_v9 = vld [vmem:[#allocation7 + $0x62c] sm:$0xf]  ;;  %v3574_v10 = vld [vmem:[#allocation7 + $0x638] sm:$0xf0] }
 0x155   :  { %2290 = vmatpush.bf16.msra.mxu2 %v3065_v23  ;;  %v3353_v23 = vor.u32 %v4087_v13, %v3350_v15 }
 0x156   :  { %2304 = vmatpush.bf16.msra.mxu3 %v3193_v29  ;;  %2264 = vmatmul.bf16.vlgmr.msra.gmra.mxu0 %v4497_v11  ;;  %v3513_v11 = vor.u32 %v4127_v48, %v3510_v49  ;;  %v3334_v29 = vld [vmem:[#allocation7 + $0x458] sm:$0xf0]  ;;  %v3609_v48 = vor.u32 %v4151_v39, %v3606_v40  ;;  %v4111_v49 = vld [vmem:[#allocation7 + $0x52c] sm:$0xf] }
 0x157   :  { %2312 = vmatpush.bf16.msrb.mxu0 %v3417_v20  ;;  %2326 = vmatpush.bf16.msrb.mxu1 %v3545_v22  ;;  %v3478_v20 = vld [vmem:[#allocation7 + $0x578] sm:$0xf0]  ;;  %v4155_v22 = vld [vmem:[#allocation7 + $0x68c] sm:$0xf]  ;;  %v4576_v15 = vpop.f32.mrf.mxu2 }
 0x158   :  { %2278 = vmatmul.bf16.vlgmr.msra.gmra.mxu1 %v4499_v16  ;;  %v3657_v16 = vor.u32 %v4163_v53, %v3654_v55  ;;  %v4147_v55 = vld [vmem:[#allocation7 + $0x64c] sm:$0xf] }
 0x159   :  { %2291 = vmatpush.bf16.msra.mxu2 %v3049_v42  ;;  %v4183_v42 = vld [vmem:[#allocation7 + $0x76c] sm:$0xf]  ;;  %v2041_v13 = vpop.f32.mrf.mxu0  ;;  %v2055_v40 = vpop.f32.mrf.mxu1 }
 0x15a   :  { %2305 = vmatpush.bf16.msra.mxu3 %v3177_v46  ;;  %v4079_v46 = vld [vmem:[#allocation7 + $0x42c] sm:$0xf]  ;;  %v3737_v53 = vor.u32 %v4183_v42, %v3734_v43  ;;  %v3689_v42 = vor.u32 %v4171_v34, %v3686_v35 }
 0x15b   :  { %2313 = vmatpush.bf16.msrb.mxu0 %v3401_v38  ;;  %2327 = vmatpush.bf16.msrb.mxu1 %v3529_v41  ;;  %v3753_v38 = vor.u32 %v4187_v25, %v3750_v52  ;;  %v3337_v41 = vor.u32 %v4083_v28, %v3334_v29  ;;  %v3577_v25 = vor.u32 %v4143_v9, %v3574_v10  ;;  %v4217_v52 = vld [vmem:[#allocation10 + $0x78] sm:$0xff]  ;;  %v4139_v28 = vld [vmem:[#allocation7 + $0x60c] sm:$0xf] }
 0x15c   :  { %2292 = vmatmul.bf16.vlgmr.msra.gmra.mxu2 %v4505_v44  ;;  %v3622_v44 = vld [vmem:[#allocation7 + $0x698] sm:$0xf0] }
 0x15d   :  { %2340 = vmatpush.bf16.msrb.mxu2 %v3673_v47  ;;  %2306 = vmatmul.bf16.vlgmr.msra.gmra.mxu3 %v4507_v50  ;;  %v3481_v50 = vor.u32 %v4119_v19, %v3478_v20  ;;  %v3625_v32 = vor.u32 %v4155_v22, %v3622_v44  ;;  %v3318_v47 = vld [vmem:[#allocation7 + $0x438] sm:$0xf0]  ;;  %v4175_v19 = vld [vmem:[#allocation7 + $0x72c] sm:$0xf]  ;;  %v3433_v22 = vor.u32 %v4107_v4, %v3430_v5  ;;  %v4212_v4 = vld [vmem:[#allocation10 + $0x50] sm:$0xff] }
 0x15e   :  { %2354 = vmatpush.bf16.msrb.mxu3 %v3801_v51  ;;  %v3446_v51 = vld [vmem:[#allocation7 + $0x538] sm:$0xf0]  ;;  %v3321_v59 = vor.u32 %v4079_v46, %v3318_v47 }
 0x15f   :  { %2314 = vmatpush.bf16.msrb.mxu0 %v3385_v57  ;;  %2328 = vmatpush.bf16.msrb.mxu1 %v3513_v11  ;;  %v3590_v57 = vld [vmem:[#allocation7 + $0x658] sm:$0xf0]  ;;  %v4179_v11 = vld [vmem:[#allocation7 + $0x74c] sm:$0xf]  ;;  %v2069_v47 = vpop.f32.mrf.mxu2 }
 0x160   :  { %v3702_v20 = vld [vmem:[#allocation7 + $0x738] sm:$0xf0] }
 0x161   :  { %2341 = vmatpush.bf16.msrb.mxu2 %v3657_v16  ;;  %v3449_v16 = vor.u32 %v4111_v49, %v3446_v51  ;;  %v4209_v44 = vld [vmem:[#allocation10 + $0x38] sm:$0xff]  ;;  %v633_v49 = vperm.slane %v4573_v63, 1 }
 0x162   :  { %2355 = vmatpush.bf16.msrb.mxu3 %v3785_v3  ;;  %v3593_v3 = vor.u32 %v4147_v55, %v3590_v57  ;;  %v3558_v29 = vld [vmem:[#allocation7 + $0x618] sm:$0xf0]  ;;  %v2057_v55 = vpop.f32.mrf.mxu1 }
 0x163   :  { %2315 = vmatpush.bf16.msrb.mxu0 %v3369_v6  ;;  %2329 = vmatpush.bf16.msrb.mxu1 %v3497_v12  ;;  %v3721_v6 = vor.u32 %v4179_v11, %v3718_v62  ;;  %v632_v12 = vperm.slane %v4573_v63, 0  ;;  %v4205_v57 = vld [vmem:[#allocation10 + $0x18] sm:$0xff] }
 0x165   :  { %2342 = vmatpush.bf16.msrb.mxu2 %v3641_v18  ;;  %v3305_v18 = vor.u32 %v4075_v0, %v3302_v2  ;;  %v4204_v2 = vld [vmem:[#allocation10 + $0x10] sm:$0xff] }
 0x166   :  { %2356 = vmatpush.bf16.msrb.mxu3 %v3769_v21  ;;  %v4578_v21 = vpop.f32.mrf.mxu3 }
 0x167   :  { %2316 = vmatpush.bf16.msrb.mxu0 %v3353_v23  ;;  %2330 = vmatpush.bf16.msrb.mxu1 %v3481_v50  ;;  %v1932_v23 = vadd.f32 %v4545_v7, %v632_v12  ;;  %v3705_v50 = vor.u32 %v4175_v19, %v3702_v20  ;;  %v3561_v7 = vor.u32 %v4139_v28, %v3558_v29 }
 0x169   :  { %2343 = vmatpush.bf16.msrb.mxu2 %v3625_v32  ;;  %v1930_v32 = vadd.f32 %v4541_v27, %v632_v12  ;;  %v1946_v39 = vadd.f32 %v4551_v37, %v1932_v23  ;;  %v2043_v37 = vpop.f32.mrf.mxu0  ;;  %v4203_v12 = vld [vmem:[#allocation10 + $0x8] sm:$0xff] }
 0x16a   :  { %2357 = vmatpush.bf16.msrb.mxu3 %v3753_v38  ;;  %v4208_v38 = vld [vmem:[#allocation10 + $0x30] sm:$0xff]  ;;  %v2044_v62 = vadd.f32 %v2043_v37, %v633_v49 }
 0x16b   :  { %2317 = vmatpush.bf16.msrb.mxu0 %v3337_v41  ;;  %2331 = vmatpush.bf16.msrb.mxu1 %v3465_v45  ;;  %v4216_v41 = vld [vmem:[#allocation10 + $0x70] sm:$0xff]  ;;  %v1944_v43 = vadd.f32 %v4543_v54, %v1930_v32  ;;  %v1960_v27 = vadd.f32 %v4557_v26, %v1946_v39  ;;  %v4207_v45 = vld [vmem:[#allocation10 + $0x28] sm:$0xff]  ;;  %v4206_v54 = vld [vmem:[#allocation10 + $0x20] sm:$0xff]  ;;  %v2042_v26 = vadd.f32 %v2041_v13, %v633_v49 }
 0x16c   :  { %v2058_v5 = vadd.f32 %v2057_v55, %v2044_v62  ;;  %v4211_v13 = vld [vmem:[#allocation10 + $0x48] sm:$0xff] }
 0x16d   :  { %2344 = vmatpush.bf16.msrb.mxu2 %v3609_v48  ;;  %v1958_v46 = vadd.f32 %v4547_v8, %v1944_v43  ;;  %v4215_v48 = vld [vmem:[#allocation10 + $0x68] sm:$0xff]  ;;  %v4214_v8 = vld [vmem:[#allocation10 + $0x60] sm:$0xff]  ;;  %v4224_v43 = vld [vmem:[#allocation10 + $0xb0] sm:$0xff] }
 0x16e   :  { %2358 = vmatpush.bf16.msrb.mxu3 %v3737_v53  ;;  %v2083_v51 = vpop.f32.mrf.mxu3 }
 0x16f   :  { %2318 = vmatpush.bf16.msrb.mxu0 %v3321_v59  ;;  %2332 = vmatpush.bf16.msrb.mxu1 %v3449_v16 }
 0x171   :  { %2345 = vmatpush.bf16.msrb.mxu2 %v3593_v3 }
 0x172   :  { %2359 = vmatpush.bf16.msrb.mxu3 %v3721_v6 }
 0x173   :  { %2319 = vmatpush.bf16.msrb.mxu0 %v3305_v18  ;;  %2333 = vmatpush.bf16.msrb.mxu1 %v3433_v22  ;;  %v2097_v11 = vpop.f32.mrf.mxu0 }
 0x175   :  { %2346 = vmatpush.bf16.msrb.mxu2 %v3577_v25  ;;  %v2111_v6 = vpop.f32.mrf.mxu1 }
 0x176   :  { %2360 = vmatpush.bf16.msrb.mxu3 %v3705_v50  ;;  %2320 = vmatmul.bf16.vlgmr.msrb.gmra.mxu0 %v4513_v24  ;;  %v1974_v24 = vadd.f32 %v4559_v61, %v1960_v27  ;;  %v4213_v61 = vld [vmem:[#allocation10 + $0x58] sm:$0xff]  ;;  %v4223_v27 = vld [vmem:[#allocation10 + $0xa8] sm:$0xff] }
 0x177   :  { %2640 = vmatpush.bf16.msra.mxu0 %v4209_v44  ;;  %2654 = vmatpush.bf16.msra.mxu1 %v4217_v52  ;;  %v4202_v44 = vld [vmem:[#allocation10] sm:$0xff] }
 0x178   :  { %2334 = vmatmul.bf16.vlgmr.msrb.gmra.mxu1 %v4515_v33  ;;  %v1972_v33 = vadd.f32 %v4549_v14, %v1958_v46  ;;  %v1988_v53 = vadd.f32 %v4565_v30, %v1974_v24  ;;  %v2071_v14 = vpop.f32.mrf.mxu2  ;;  %v4221_v46 = vld [vmem:[#allocation10 + $0x98] sm:$0xff] }
 0x179   :  { %2347 = vmatpush.bf16.msrb.mxu2 %v3561_v7  ;;  %v2072_v10 = vadd.f32 %v2071_v14, %v2058_v5 }
 0x17a   :  { %2361 = vmatpush.bf16.msrb.mxu3 %v3689_v42  ;;  %v1986_v59 = vadd.f32 %v4555_v56, %v1972_v33  ;;  %v2002_v16 = vadd.f32 %v4571_v58, %v1988_v53  ;;  %v634_v33 = vperm.slane %v4573_v63, 2 }
 0x17b   :  { %2641 = vmatpush.bf16.msra.mxu0 %v4208_v38  ;;  %2655 = vmatpush.bf16.msra.mxu1 %v4216_v41 }
 0x17c   :  { %2348 = vmatmul.bf16.vlgmr.msrb.gmra.mxu2 %v4519_v60  ;;  %v2056_v60 = vadd.f32 %v2055_v40, %v2042_v26  ;;  %v2000_v3 = vadd.f32 %v4563_v17, %v1986_v59  ;;  %v2016_v30 = vadd.f32 %v4576_v15, %v2002_v16  ;;  %v2099_v17 = vpop.f32.mrf.mxu0 }
 0x17d   :  { %2362 = vmatmul.bf16.vlgmr.msrb.gmra.mxu3 %v4521_v1  ;;  %v2085_v1 = vpop.f32.mrf.mxu3  ;;  %v2113_v29 = vpop.f32.mrf.mxu1 }
 0x17e   :  { %v2070_v0 = vadd.f32 %v2069_v47, %v2056_v60  ;;  %v2014_v56 = vadd.f32 %v4567_v31, %v2000_v3  ;;  %v2030_v58 = vadd.f32 %v4578_v21, %v2016_v30  ;;  %v2086_v15 = vadd.f32 %v2085_v1, %v2072_v10  ;;  %v4210_v31 = vld [vmem:[#allocation10 + $0x40] sm:$0xff]  ;;  %v4220_v47 = vld [vmem:[#allocation10 + $0x90] sm:$0xff] }
 0x17f   :  { %2642 = vmatpush.bf16.msra.mxu0 %v4207_v45  ;;  %2656 = vmatpush.bf16.msra.mxu1 %v4215_v48  ;;  %v4222_v45 = vld [vmem:[#allocation10 + $0xa0] sm:$0xff]  ;;  %v4219_v48 = vld [vmem:[#allocation10 + $0x88] sm:$0xff] }
 0x180   :  { %v2084_v9 = vadd.f32 %v2083_v51, %v2070_v0  ;;  %v2028_v19 = vadd.f32 %v4569_v36, %v2014_v56  ;;  %v2125_v20 = vpop.f32.mrf.mxu2  ;;  %v2372_v23 = vmax.f32 %v2030_v58, 0.0  ;;  %v2100_v52 = vadd.f32 %v2099_v17, %v2086_v15  ;;  %v4225_v36 = vld [vmem:[#allocation10 + $0xb8] sm:$0xff]  ;;  %v4218_v51 = vld [vmem:[#allocation10 + $0x80] sm:$0xff] }
 0x181   :  { %2668 = vmatpush.bf16.msra.mxu2 %v4225_v36  ;;  %v4233_v58 = vld [vmem:[#allocation10 + $0xf8] sm:$0xff]  ;;  %v635_v36 = vperm.slane %v4573_v63, 3 }
 0x182   :  { %v2098_v18 = vadd.f32 %v2097_v11, %v2084_v9  ;;  %v2368_v50 = vmax.f32 %v2028_v19, 0.0  ;;  %v2114_v32 = vadd.f32 %v2113_v29, %v2100_v52  ;;  %2682 = vmatpush.bf16.msra.mxu3 %v4233_v58  ;;  %v4226_v29 = vld [vmem:[#allocation10 + $0xc0] sm:$0xff] }
 0x183   :  { %2643 = vmatpush.bf16.msra.mxu0 %v4206_v54  ;;  %2657 = vmatpush.bf16.msra.mxu1 %v4214_v8 }
 0x184   :  { %v2112_v25 = vadd.f32 %v2111_v6, %v2098_v18  ;;  %v2376_v21 = vpack.c.bf16 %v2372_v23, %v2368_v50  ;;  %v4231_v23 = vld [vmem:[#allocation10 + $0xe8] sm:$0xff]  ;;  %v4228_v50 = vld [vmem:[#allocation10 + $0xd0] sm:$0xff] }
 0x185   :  { %v2139_v22 = vpop.f32.mrf.mxu3  ;;  %2669 = vmatpush.bf16.msra.mxu2 %v4224_v43 }
 0x186   :  { %v2126_v28 = vadd.f32 %v2125_v20, %v2112_v25  ;;  %v4229_v25 = vld [vmem:[#allocation10 + $0xd8] sm:$0xff] }
 0x187   :  { %2644 = vmatpush.bf16.msra.mxu0 %v4205_v57  ;;  %2658 = vmatpush.bf16.msra.mxu1 %v4213_v61 }
 0x188   :  { %v2127_v34 = vpop.f32.mrf.mxu2  ;;  %v2140_v35 = vadd.f32 %v2139_v22, %v2126_v28  ;;  %v4227_v28 = vld [vmem:[#allocation10 + $0xc8] sm:$0xff] }
 0x189   :  { %v2128_v38 = vadd.f32 %v2127_v34, %v2114_v32  ;;  %2670 = vmatpush.bf16.msra.mxu2 %v4223_v27 }
 0x18a   :  { %v2369_v7 = vmax.f32 %v2140_v35, 0.0 }
 0x18b   :  { %2645 = vmatpush.bf16.msra.mxu0 %v4204_v2  ;;  %2659 = vmatpush.bf16.msra.mxu1 %v4212_v4 }
 0x18d   :  { %v2141_v39 = vpop.f32.mrf.mxu3  ;;  %2671 = vmatpush.bf16.msra.mxu2 %v4222_v45 }
 0x18e   :  { %v2142_v40 = vadd.f32 %v2141_v39, %v2128_v38 }
 0x18f   :  { %2646 = vmatpush.bf16.msra.mxu0 %v4203_v12  ;;  %2660 = vmatpush.bf16.msra.mxu1 %v4211_v13 }
 0x190   :  { %v2373_v41 = vmax.f32 %v2142_v40, 0.0 }
 0x191   :  { %2672 = vmatpush.bf16.msra.mxu2 %v4221_v46 }
 0x192   :  { %v2377_v42 = vpack.c.bf16 %v2373_v41, %v2369_v7 }
 0x193   :  { %2647 = vmatpush.bf16.msra.mxu0 %v4202_v44  ;;  %2661 = vmatpush.bf16.msra.mxu1 %v4210_v31  ;;  %v2153_v37 = vpop.f32.mrf.mxu0  ;;  %v4232_v44 = vld [vmem:[#allocation10 + $0xf0] sm:$0xff]  ;;  %v4230_v31 = vld [vmem:[#allocation10 + $0xe0] sm:$0xff] }
 0x194   :  { %v2154_v26 = vadd.f32 %v2153_v37, %v634_v33  ;;  %2683 = vmatpush.bf16.msra.mxu3 %v4232_v44 }
 0x195   :  { %2673 = vmatpush.bf16.msra.mxu2 %v4220_v47  ;;  %v2167_v49 = vpop.f32.mrf.mxu1 }
 0x196   :  { %2648 = vmatmul.bf16.vlgmr.msra.gmra.mxu0 %v2376_v21  ;;  %2662 = vmatmul.bf16.vlgmr.msra.gmra.mxu1 %v2377_v42  ;;  %v2168_v57 = vadd.f32 %v2167_v49, %v2154_v26 }
 0x198   :  { %2684 = vmatpush.bf16.msra.mxu3 %v4231_v23 }
 0x199   :  { %2674 = vmatpush.bf16.msra.mxu2 %v4219_v48 }
 0x19b   :  { %v2155_v24 = vpop.f32.mrf.mxu0 }
 0x19c   :  { %v2156_v59 = vadd.f32 %v2155_v24, %v634_v33  ;;  %2685 = vmatpush.bf16.msra.mxu3 %v4230_v31 }
 0x19d   :  { %2675 = vmatpush.bf16.msra.mxu2 %v4218_v51  ;;  %v2169_v53 = vpop.f32.mrf.mxu1 }
 0x19e   :  { %v2170_v62 = vadd.f32 %v2169_v53, %v2156_v59 }
 0x19f   :  { %v2181_v54 = vpop.f32.mrf.mxu2 }
 0x1a0   :  { %v2195_v8 = vpop.f32.mrf.mxu3  ;;  %v2182_v61 = vadd.f32 %v2181_v54, %v2168_v57  ;;  %2686 = vmatpush.bf16.msra.mxu3 %v4229_v25 }
 0x1a2   :  { %v2196_v14 = vadd.f32 %v2195_v8, %v2182_v61 }
 0x1a4   :  { %2687 = vmatpush.bf16.msra.mxu3 %v4228_v50 }
 0x1a7   :  { %v2183_v11 = vpop.f32.mrf.mxu2 }
 0x1a8   :  { %v2197_v60 = vpop.f32.mrf.mxu3  ;;  %v2184_v0 = vadd.f32 %v2183_v11, %v2170_v62  ;;  %2688 = vmatpush.bf16.msra.mxu3 %v4227_v28 }
 0x1aa   :  { %v2198_v30 = vadd.f32 %v2197_v60, %v2184_v0  ;;  %v4248_v0 = vld [vmem:[%s4618_s6] ss:$0 sm:$0xff] }
 0x1ac   :  { %2689 = vmatpush.bf16.msra.mxu3 %v4226_v29 }
 0x1b3   :  { %v2209_v55 = vpop.f32.mrf.mxu0 }
 0x1b4   :  { %v2210_v1 = vadd.f32 %v2209_v55, %v2196_v14 }
 0x1b5   :  { %v2223_v16 = vpop.f32.mrf.mxu1 }
 0x1b6   :  { %v2224_v5 = vadd.f32 %v2223_v16, %v2210_v1 }
 0x1bb   :  { %v2211_v2 = vpop.f32.mrf.mxu0 }
 0x1bc   :  { %v2212_v56 = vadd.f32 %v2211_v2, %v2198_v30 }
 0x1bd   :  { %v2225_v9 = vpop.f32.mrf.mxu1 }
 0x1be   :  { %v2226_v10 = vadd.f32 %v2225_v9, %v2212_v56 }
 0x1bf   :  { %v2237_v3 = vpop.f32.mrf.mxu2 }
 0x1c0   :  { %v2251_v4 = vpop.f32.mrf.mxu3  ;;  %v2238_v6 = vadd.f32 %v2237_v3, %v2224_v5 }
 0x1c2   :  { %v2252_v13 = vadd.f32 %v2251_v4, %v2238_v6 }
 0x1c4   :  { %v2370_v20 = vmax.f32 %v2252_v13, 0.0 }
 0x1c7   :  { %v2239_v12 = vpop.f32.mrf.mxu2 }
 0x1c8   :  { %v2240_v18 = vadd.f32 %v2239_v12, %v2226_v10  ;;  %v2253_v19 = vpop.f32.mrf.mxu3 }
 0x1ca   :  { %v2254_v17 = vadd.f32 %v2253_v19, %v2240_v18 }
 0x1cc   :  { %v2374_v15 = vmax.f32 %v2254_v17, 0.0 }
 0x1ce   :  { %v2378_v22 = vpack.c.bf16 %v2374_v15, %v2370_v20 }
 0x1d0   :  { %2676 = vmatmul.bf16.vlgmr.msra.gmra.mxu2 %v2378_v22 }
 0x1d3   :  { %v2265_v52 = vpop.f32.mrf.mxu0 }
 0x1d4   :  { %v2266_v38 = vadd.f32 %v2265_v52, %v635_v36 }
 0x1d5   :  { %v2279_v21 = vpop.f32.mrf.mxu1 }
 0x1d6   :  { %v2280_v7 = vadd.f32 %v2279_v21, %v2266_v38 }
 0x1db   :  { %v2267_v32 = vpop.f32.mrf.mxu0 }
 0x1dc   :  { %v2268_v41 = vadd.f32 %v2267_v32, %v635_v36 }
 0x1dd   :  { %v2281_v39 = vpop.f32.mrf.mxu1 }
 0x1de   :  { %v2282_v45 = vadd.f32 %v2281_v39, %v2268_v41 }
 0x1df   :  { %v2293_v34 = vpop.f32.mrf.mxu2 }
 0x1e0   :  { %v2307_v35 = vpop.f32.mrf.mxu3  ;;  %v2294_v43 = vadd.f32 %v2293_v34, %v2280_v7 }
 0x1e2   :  { %v2308_v37 = vadd.f32 %v2307_v35, %v2294_v43 }
 0x1e7   :  { %v2295_v42 = vpop.f32.mrf.mxu2 }
 0x1e8   :  { %v2309_v27 = vpop.f32.mrf.mxu3  ;;  %v2296_v47 = vadd.f32 %v2295_v42, %v2282_v45 }
 0x1ea   :  { %v2310_v24 = vadd.f32 %v2309_v27, %v2296_v47 }
 0x1f3   :  { %v2321_v40 = vpop.f32.mrf.mxu0 }
 0x1f4   :  { %v2322_v48 = vadd.f32 %v2321_v40, %v2308_v37 }
 0x1f5   :  { %v2335_v46 = vpop.f32.mrf.mxu1 }
 0x1f6   :  { %v2336_v63 = vadd.f32 %v2335_v46, %v2322_v48 }
 0x1fb   :  { %v2323_v49 = vpop.f32.mrf.mxu0 }
 0x1fc   :  { %v2324_v33 = vadd.f32 %v2323_v49, %v2310_v24 }
 0x1fd   :  { %v2337_v26 = vpop.f32.mrf.mxu1 }
 0x1fe   :  { %v2338_v53 = vadd.f32 %v2337_v26, %v2324_v33 }
 0x1ff   :  { %v2349_v51 = vpop.f32.mrf.mxu2 }
 0x200   :  { %v2363_v54 = vpop.f32.mrf.mxu3  ;;  %v2350_v8 = vadd.f32 %v2349_v51, %v2336_v63 }
 0x202   :  { %v2364_v57 = vadd.f32 %v2363_v54, %v2350_v8 }
 0x204   :  { %v2371_v60 = vmax.f32 %v2364_v57, 0.0 }
 0x207   :  { %v2351_v55 = vpop.f32.mrf.mxu2 }
 0x208   :  { %v2352_v59 = vadd.f32 %v2351_v55, %v2338_v53  ;;  %v2365_v11 = vpop.f32.mrf.mxu3 }
 0x20a   :  { %v2366_v61 = vadd.f32 %v2365_v11, %v2352_v59 }
 0x20c   :  { %v2375_v62 = vmax.f32 %v2366_v61, 0.0 }
 0x20e   :  { %v2379_v16 = vpack.c.bf16 %v2375_v62, %v2371_v60 }
 0x210   :  { %2690 = vmatmul.bf16.vlgmr.msra.gmra.mxu3 %v2379_v16 }
 0x213   :  { %v2649_v14 = vpop.f32.mrf.mxu0  ;;  %v2663_v1 = vpop.f32.mrf.mxu1 }
 0x214   :  { %v2650_v3 = vadd.f32 %v4248_v0, %v2649_v14 }
 0x216   :  { %v2664_v30 = vadd.f32 %v2663_v1, %v2650_v3 }
 0x21b   :  { %v2651_v5 = vpop.f32.mrf.mxu0  ;;  %v2665_v9 = vpop.f32.mrf.mxu1 }
 0x21c   :  { %v2652_v10 = vadd.f32 %v4248_v0, %v2651_v5 }
 0x21e   :  { %v2666_v58 = vadd.f32 %v2665_v9, %v2652_v10 }
 0x253   :  { %v2677_v2 = vpop.f32.mrf.mxu2 }
 0x254   :  { %v2678_v4 = vadd.f32 %v2677_v2, %v2664_v30 }
 0x25b   :  { %v2679_v12 = vpop.f32.mrf.mxu2 }
 0x25c   :  { %v2680_v13 = vadd.f32 %v2679_v12, %v2666_v58 }
 0x293   :  { %v2691_v56 = vpop.f32.mrf.mxu3 }
 0x294   :  { %v2692_v6 = vadd.f32 %v2691_v56, %v2678_v4 }
 0x296   :  { %2696 = vst [vmem:[%s4619_s7] sm:$0xff] %v2692_v6 }
 0x29b   :  { %v2693_v18 = vpop.f32.mrf.mxu3 }
 0x29c   :  { %v2694_v19 = vadd.f32 %v2693_v18, %v2680_v13 }
 0x29e   :  { %2697 = vst [vmem:[%s4619_s7 + $0x8] sm:$0xff] %v2694_v19 }
 0x29f   :  { %2702 = vsyncpa [#allocation3], 1 }
 0x2a0   :  { %2703 = vsyncpa [#allocation5], 1 }
 0x2a1   :  { %2704 = vsyncpa [#allocation8], 1 }
 0x2a2   :  { %2705 = vsyncpa [#allocation11], 1 }

</bundles_post_ra>
